<compile_context>
chip_gen: v7x
topology: tpu7x:2x2x1
jax: 0.10.0
libtpu: 0.0.40
codegen_flags: <defaults>
</compile_context>

<pallas_src>
import functools

import jax
import jax.numpy as jnp
import numpy as np
from jax.experimental import pallas as pl
from jax.experimental.pallas import tpu as pltpu


def _neg_sq_dist(x, c, d):
    """sim[j, i] = -||x[:, i] - c[j, :]||^2, x: (d, n), c: (m, d) -> (m, n).

    Unrolled over d (d == 3) on the VPU; numerically more stable in f32 than the
    2ab - a^2 - b^2 form the torch reference evaluates in float64.
    """
    acc = None
    for dd in range(d):
        diff = x[dd:dd + 1, :] - c[:, dd:dd + 1]   # (1,n) - (m,1) -> (m,n)
        sq = diff * diff
        acc = sq if acc is None else acc + sq
    return -acc


def _kmeans_fused_kernel(points_ref,    # (d, n)  f32  VMEM (batch squeezed)
                         features_ref,  # (F, n)  f32  VMEM
                         init_c_ref,    # (m, d)  f32  VMEM
                         cents_ref,     # (m, d)  f32  VMEM out
                         feats_ref,     # (F, m)  f32  VMEM out
                         labels_ref,    # (1, n)  i32  VMEM out
                         *, max_iter, tol, k):
    d, n = points_ref.shape
    m = cents_ref.shape[0]

    x = points_ref[...].astype(jnp.float32)                      # (d, n)
    row_ids = jax.lax.broadcasted_iota(jnp.int32, (m, n), 0)     # cluster id per row

    def assign_and_update(c):
        sim = _neg_sq_dist(x, c, d)                              # (m, n)
        # unrolled argmax over the m cluster rows (first occurrence on ties,
        # matching torch.max semantics)
        best_val = sim[0:1, :]                                   # (1, n)
        best_idx = jnp.zeros((1, n), jnp.int32)
        for j in range(1, m):
            v = sim[j:j + 1, :]
            better = v > best_val
            best_val = jnp.where(better, v, best_val)
            best_idx = jnp.where(better, jnp.int32(j), best_idx)
        onehot = (best_idx == row_ids).astype(jnp.float32)       # (m, n)
        counts = jnp.sum(onehot, axis=1, keepdims=True)          # (m, 1)
        # centroid numerator: contraction over n (K = n = 256 on the MXU)
        cg_num = jax.lax.dot_general(onehot, x, (((1,), (1,)), ((), ())),
                                     preferred_element_type=jnp.float32)  # (m, d)
        cg = cg_num / (counts + 1e-8)                            # exact divide (tiny)
        err = jnp.sum((cg - c) ** 2, keepdims=True)              # (1, 1)
        return best_idx, cg, err

    def iter_body(it, carry):
        c, lbl, err = carry
        new_lbl, new_c, new_err = assign_and_update(c)
        active = err > tol                                       # (1, 1) bool
        c = jnp.where(active, new_c, c)
        lbl = jnp.where(active, new_lbl, lbl)
        err = jnp.where(active, new_err, err)
        return c, lbl, err

    c0 = init_c_ref[...].astype(jnp.float32)
    lbl0 = jnp.zeros((1, n), jnp.int32)
    err0 = jnp.full((1, 1), 1e30, jnp.float32)
    c_fin, lbl_fin, _ = jax.lax.fori_loop(0, max_iter, iter_body, (c0, lbl0, err0))

    cents_ref[...] = c_fin
    labels_ref[...] = lbl_fin

    # ---- feature aggregation: per-cluster top-k + softmax, vectorized over m ----
    f = features_ref[...].astype(jnp.float32)                    # (F, n)
    col_ids = jax.lax.broadcasted_iota(jnp.int32, (m, n), 1)
    neg_inf = jnp.float32(-jnp.inf)

    sim = _neg_sq_dist(x, c_fin, d)                              # (m, n) vs FINAL centroids
    masked = jnp.where(lbl_fin == row_ids, sim, neg_inf)         # (m, n)

    # statically unrolled top-k selection (k = min(max_neighbors, n) is tiny);
    # clusters with fewer than k members select only their real points
    # (mxv > -inf guard) -> effectively min(k, cluster_size) like torch.topk.
    sel = jnp.zeros((m, n), jnp.float32)
    cur = masked
    for _ in range(min(k, n)):
        mxv = jnp.max(cur, axis=1, keepdims=True)                            # (m, 1)
        idx = jnp.min(jnp.where(cur == mxv, col_ids, n), axis=1, keepdims=True)
        hit = jnp.logical_and(col_ids == idx, mxv > neg_inf)                 # (m, n)
        sel = jnp.where(hit, 1.0, sel)
        cur = jnp.where(hit, neg_inf, cur)

    mmax = jnp.max(masked, axis=1, keepdims=True)                # (m, 1)
    w = jnp.where(sel > 0.0, jnp.exp(masked - mmax), 0.0)        # (m, n)
    wsum = jnp.maximum(jnp.sum(w, axis=1, keepdims=True), 1e-20)
    w = w / wsum                                                 # softmax over top-k
    # single MXU matmul: (F, n) x (m, n)^T -> (F, m), one unmasked full-block store
    feats_ref[...] = jax.lax.dot_general(f, w, (((1,), (1,)), ((), ())),
                                         preferred_element_type=jnp.float32)


def make_kmeans_forward(bz, n, d, m, f_dim, max_iter, tol, max_neighbors):
    kernel = functools.partial(_kmeans_fused_kernel,
                               max_iter=max_iter, tol=tol, k=max_neighbors)

    flops_per_iter = m * n * (6 * d + 8) + 2 * m * n * d
    agg_flops = m * n * (6 * d + 10) + max_neighbors * m * n * 8 + 2 * f_dim * n * m
    cost = pl.CostEstimate(
        flops=int(bz * (max_iter * flops_per_iter + agg_flops)),
        transcendentals=int(bz * (m * n + 2 * m)),
        bytes_accessed=int(bz * 4 * (d * n + f_dim * n + 2 * m * d + f_dim * m + n)),
    )

    call = pl.pallas_call(
        kernel,
        grid=(bz,),
        in_specs=[
            pl.BlockSpec((None, d, n), lambda b: (b, 0, 0)),       # points (bz,d,n)
            pl.BlockSpec((None, f_dim, n), lambda b: (b, 0, 0)),   # features (bz,F,n)
            pl.BlockSpec((None, m, d), lambda b: (b, 0, 0)),       # init centroids
        ],
        out_specs=(
            pl.BlockSpec((None, m, d), lambda b: (b, 0, 0)),       # centroids
            pl.BlockSpec((None, f_dim, m), lambda b: (b, 0, 0)),   # cluster features
            pl.BlockSpec((None, 1, n), lambda b: (b, 0, 0)),       # labels (lane-dense)
        ),
        out_shape=(
            jax.ShapeDtypeStruct((bz, m, d), jnp.float32),
            jax.ShapeDtypeStruct((bz, f_dim, m), jnp.float32),
            jax.ShapeDtypeStruct((bz, 1, n), jnp.int32),
        ),
        compiler_params=pltpu.CompilerParams(
            dimension_semantics=("parallel",)),
        cost_estimate=cost,
    )

    @jax.jit
    def run(points, features, init_centroids):
        pts_t = jnp.transpose(points, (0, 2, 1)).astype(jnp.float32)   # (bz, d, n)
        cents, feats, labels = call(pts_t,
                                    features.astype(jnp.float32),
                                    init_centroids.astype(jnp.float32))
        return cents, feats, labels[:, 0, :]

    return run


def kmeans_forward(points, features, centroids, *, n_clusters, max_iter=100,
                   tolerance=1e-4, max_neighbors=15):
    bz, n, d = points.shape
    f_dim = features.shape[1]
    run = make_kmeans_forward(bz, n, d, n_clusters, f_dim, max_iter, tolerance,
                              max_neighbors)
    return run(points, features, centroids)   # (bz,m,3), (bz,f,m), (bz,n)


# ---------------------------- float64 NumPy reference -------------------------------
def _kmeans_ref(points, features, init_centroids, *, n_clusters, max_iter,
                tolerance, max_neighbors):
    """Mirrors KMeans.fit_predict + single_batch_forward (euclidean, no subsampling,
    differentiable=False) in float64 NumPy."""
    points = np.asarray(points, np.float64)
    features = np.asarray(features, np.float64)
    init_centroids = np.asarray(init_centroids, np.float64)
    bz, n, d = points.shape
    f_dim = features.shape[1]
    m = n_clusters

    def euc_sim(a, b):   # a: (p,d), b: (q,d) -> (p,q)
        return 2.0 * a @ b.T - (a ** 2).sum(1, keepdims=True) - (b ** 2).sum(1)[None, :]

    cents = np.zeros((bz, m, d), np.float64)
    feats = np.zeros((bz, f_dim, m), np.float64)
    labels = np.zeros((bz, n), np.int64)
    for b in range(bz):
        X, Feat, c = points[b], features[b], init_centroids[b].copy()
        closest = np.zeros((n,), np.int64)
        for _ in range(max_iter):
            closest = euc_sim(X, c).argmax(axis=1)
            mask = (closest[None, :] == np.arange(m)[:, None]).astype(np.float64)
            c_grad = mask @ X / (mask.sum(-1, keepdims=True) + 1e-8)
            error = ((c_grad - c) ** 2).sum()
            c = c_grad
            if error <= tolerance:
                break
        cents[b] = c
        labels[b] = closest
        for cls in range(m):
            idx = np.nonzero(closest == cls)[0]
            cp = X[idx]
            sim_score = euc_sim(cp, c[cls:cls + 1]).reshape(-1)
            kk = min(max_neighbors, len(cp))
            top = np.argsort(-sim_score, kind="stable")[:kk]
            sc = sim_score[top]
            sc = np.exp(sc - sc.max())
            sc = sc / sc.sum()
            feats[b, :, cls] = (Feat[:, idx][:, top] * sc[None, :]).sum(1)
    return (cents.astype(np.float32), feats.astype(np.float32),
            labels.astype(np.int32))


if __name__ == "__main__":
    BZ, N, D, M, F_DIM = 2, 256, 3, 8, 16
    MAX_ITER, TOL, MAX_NEIGHBORS = 50, 1e-4, 15

    key = jax.random.PRNGKey(0)
    k1, k2, k3, k4 = jax.random.split(key, 4)

    # well-separated synthetic clusters so fit_predict's "all clusters found"
    # invariant holds deterministically.
    centers = jax.random.normal(k1, (BZ, M, D), dtype=jnp.float32) * 10.0
    assign = jnp.tile(jnp.arange(M), N // M)                       # (N,)
    noise = jax.random.normal(k2, (BZ, N, D), dtype=jnp.float32) * 0.2
    points = centers[:, assign, :] + noise                         # (BZ, N, 3)
    features = jax.random.normal(k3, (BZ, F_DIM, N), dtype=jnp.float32)
    # deterministic initial centroids (forward() accepts explicit centroids);
    # this replaces torch's np.random.choice init.
    init_centroids = centers + jax.random.normal(k4, (BZ, M, D), dtype=jnp.float32) * 0.1

    cluster_centroids, cluster_features, labels = kmeans_forward(
        points, features, init_centroids,
        n_clusters=M, max_iter=MAX_ITER, tolerance=TOL,
        max_neighbors=MAX_NEIGHBORS)
    jax.block_until_ready((cluster_centroids, cluster_features, labels))

    assert cluster_centroids.shape == (BZ, M, D)
    assert cluster_features.shape == (BZ, F_DIM, M)
    assert labels.shape == (BZ, N)
    assert not bool(jnp.any(jnp.isnan(cluster_centroids)))
    assert not bool(jnp.any(jnp.isnan(cluster_features)))

    # replicate fit_predict's all-clusters-present check (host side).
    for b in range(BZ):
        if len(np.unique(np.asarray(labels[b]))) != M:
            raise ValueError("KMeans failed to find all clusters")

    # correctness vs float64 NumPy reference of the torch module
    ref_c, ref_f, ref_l = _kmeans_ref(points, features, init_centroids,
                                      n_clusters=M, max_iter=MAX_ITER,
                                      tolerance=TOL, max_neighbors=MAX_NEIGHBORS)
    np.testing.assert_array_equal(np.asarray(labels), ref_l)
    np.testing.assert_allclose(np.asarray(cluster_centroids), ref_c,
                               rtol=2e-3, atol=2e-3)
    np.testing.assert_allclose(np.asarray(cluster_features), ref_f,
                               rtol=2e-3, atol=2e-3)

    print("KERNEL_OK")
</pallas_src>

<mosaic_0001>
module attributes {stable_mosaic.version = 11 : i64} {
  func.func @_kmeans_fused_kernel(%arg0: i32, %arg1: memref<1x3x256xf32, #tpu.memory_space<vmem>>, %arg2: memref<1x16x256xf32, #tpu.memory_space<vmem>>, %arg3: memref<1x8x3xf32, #tpu.memory_space<vmem>>, %arg4: memref<1x8x3xf32, #tpu.memory_space<vmem>>, %arg5: memref<1x16x8xf32, #tpu.memory_space<vmem>>, %arg6: memref<1x1x256xi32, #tpu.memory_space<vmem>>) attributes {dimension_semantics = [#tpu.dimension_semantics<parallel>], iteration_bounds = array<i64: 2>, scalar_prefetch = 0 : i64, scratch_operands = 0 : i64, tpu.core_type = #tpu.core_type<tc>, window_params = [{transform_indices = @transform_0, window_bounds = array<i64: 1, 3, 256>}, {transform_indices = @transform_1, window_bounds = array<i64: 1, 16, 256>}, {transform_indices = @transform_2, window_bounds = array<i64: 1, 8, 3>}, {transform_indices = @transform_3, window_bounds = array<i64: 1, 8, 3>}, {transform_indices = @transform_4, window_bounds = array<i64: 1, 16, 8>}, {transform_indices = @transform_5, window_bounds = array<i64: 1, 1, 256>}]} {
    %c0 = arith.constant 0 : index
    %c0_0 = arith.constant 0 : index
    %c0_1 = arith.constant 0 : index
    %0 = vector.load %arg1[%c0, %c0_0, %c0_1] : memref<1x3x256xf32, #tpu.memory_space<vmem>>, vector<1x3x256xf32>
    %1 = vector.shape_cast %0 : vector<1x3x256xf32> to vector<3x256xf32>
    %2 = tpu.iota {dimensions = array<i32: 0>} : vector<8x256xi32>
    %c0_2 = arith.constant 0 : index
    %c0_3 = arith.constant 0 : index
    %c0_4 = arith.constant 0 : index
    %3 = vector.load %arg3[%c0_2, %c0_3, %c0_4] : memref<1x8x3xf32, #tpu.memory_space<vmem>>, vector<1x8x3xf32>
    %4 = vector.shape_cast %3 : vector<1x8x3xf32> to vector<8x3xf32>
    %c0_i32 = arith.constant 0 : i32
    %5 = vector.broadcast %c0_i32 : i32 to vector<1x256xi32>
    %cst = arith.constant 1.000000e+30 : f32
    %6 = vector.broadcast %cst : f32 to vector<1x1xf32>
    %c0_i32_5 = arith.constant 0 : i32
    %c50_i32 = arith.constant 50 : i32
    %7 = arith.addi %c0_i32_5, %c50_i32 : i32
    %c1_i32 = arith.constant 1 : i32
    %8:3 = scf.for %arg7 = %c0_i32_5 to %7 step %c1_i32 iter_args(%arg8 = %4, %arg9 = %5, %arg10 = %6) -> (vector<8x3xf32>, vector<1x256xi32>, vector<1x1xf32>)  : i32 {
      %332 = vector.extract_strided_slice %1 {offsets = [0, 0], sizes = [1, 256], strides = [1, 1]} : vector<3x256xf32> to vector<1x256xf32>
      %333 = vector.extract_strided_slice %arg8 {offsets = [0, 0], sizes = [8, 1], strides = [1, 1]} : vector<8x3xf32> to vector<8x1xf32>
      %334 = vector.broadcast %332 : vector<1x256xf32> to vector<8x256xf32>
      %335 = vector.broadcast %333 : vector<8x1xf32> to vector<8x256xf32>
      %336 = arith.subf %334, %335 : vector<8x256xf32>
      %337 = arith.mulf %336, %336 : vector<8x256xf32>
      %338 = vector.extract_strided_slice %1 {offsets = [1, 0], sizes = [1, 256], strides = [1, 1]} : vector<3x256xf32> to vector<1x256xf32>
      %339 = vector.extract_strided_slice %arg8 {offsets = [0, 1], sizes = [8, 1], strides = [1, 1]} : vector<8x3xf32> to vector<8x1xf32>
      %340 = vector.broadcast %338 : vector<1x256xf32> to vector<8x256xf32>
      %341 = vector.broadcast %339 : vector<8x1xf32> to vector<8x256xf32>
      %342 = arith.subf %340, %341 : vector<8x256xf32>
      %343 = arith.mulf %342, %342 : vector<8x256xf32>
      %344 = arith.addf %337, %343 : vector<8x256xf32>
      %345 = vector.extract_strided_slice %1 {offsets = [2, 0], sizes = [1, 256], strides = [1, 1]} : vector<3x256xf32> to vector<1x256xf32>
      %346 = vector.extract_strided_slice %arg8 {offsets = [0, 2], sizes = [8, 1], strides = [1, 1]} : vector<8x3xf32> to vector<8x1xf32>
      %347 = vector.broadcast %345 : vector<1x256xf32> to vector<8x256xf32>
      %348 = vector.broadcast %346 : vector<8x1xf32> to vector<8x256xf32>
      %349 = arith.subf %347, %348 : vector<8x256xf32>
      %350 = arith.mulf %349, %349 : vector<8x256xf32>
      %351 = arith.addf %344, %350 : vector<8x256xf32>
      %cst_115 = arith.constant 0.000000e+00 : f32
      %352 = vector.broadcast %cst_115 : f32 to vector<8x256xf32>
      %353 = arith.subf %352, %351 : vector<8x256xf32>
      %354 = vector.extract_strided_slice %353 {offsets = [0, 0], sizes = [1, 256], strides = [1, 1]} : vector<8x256xf32> to vector<1x256xf32>
      %c0_i32_116 = arith.constant 0 : i32
      %355 = vector.broadcast %c0_i32_116 : i32 to vector<1x256xi32>
      %356 = vector.extract_strided_slice %353 {offsets = [1, 0], sizes = [1, 256], strides = [1, 1]} : vector<8x256xf32> to vector<1x256xf32>
      %357 = arith.cmpf ogt, %356, %354 : vector<1x256xf32>
      %358 = arith.select %357, %356, %354 : vector<1x256xi1>, vector<1x256xf32>
      %c1_i32_117 = arith.constant 1 : i32
      %359 = vector.broadcast %c1_i32_117 : i32 to vector<1x256xi32>
      %360 = arith.select %357, %359, %355 : vector<1x256xi1>, vector<1x256xi32>
      %361 = vector.extract_strided_slice %353 {offsets = [2, 0], sizes = [1, 256], strides = [1, 1]} : vector<8x256xf32> to vector<1x256xf32>
      %362 = arith.cmpf ogt, %361, %358 : vector<1x256xf32>
      %363 = arith.select %362, %361, %358 : vector<1x256xi1>, vector<1x256xf32>
      %c2_i32 = arith.constant 2 : i32
      %364 = vector.broadcast %c2_i32 : i32 to vector<1x256xi32>
      %365 = arith.select %362, %364, %360 : vector<1x256xi1>, vector<1x256xi32>
      %366 = vector.extract_strided_slice %353 {offsets = [3, 0], sizes = [1, 256], strides = [1, 1]} : vector<8x256xf32> to vector<1x256xf32>
      %367 = arith.cmpf ogt, %366, %363 : vector<1x256xf32>
      %368 = arith.select %367, %366, %363 : vector<1x256xi1>, vector<1x256xf32>
      %c3_i32 = arith.constant 3 : i32
      %369 = vector.broadcast %c3_i32 : i32 to vector<1x256xi32>
      %370 = arith.select %367, %369, %365 : vector<1x256xi1>, vector<1x256xi32>
      %371 = vector.extract_strided_slice %353 {offsets = [4, 0], sizes = [1, 256], strides = [1, 1]} : vector<8x256xf32> to vector<1x256xf32>
      %372 = arith.cmpf ogt, %371, %368 : vector<1x256xf32>
      %373 = arith.select %372, %371, %368 : vector<1x256xi1>, vector<1x256xf32>
      %c4_i32 = arith.constant 4 : i32
      %374 = vector.broadcast %c4_i32 : i32 to vector<1x256xi32>
      %375 = arith.select %372, %374, %370 : vector<1x256xi1>, vector<1x256xi32>
      %376 = vector.extract_strided_slice %353 {offsets = [5, 0], sizes = [1, 256], strides = [1, 1]} : vector<8x256xf32> to vector<1x256xf32>
      %377 = arith.cmpf ogt, %376, %373 : vector<1x256xf32>
      %378 = arith.select %377, %376, %373 : vector<1x256xi1>, vector<1x256xf32>
      %c5_i32 = arith.constant 5 : i32
      %379 = vector.broadcast %c5_i32 : i32 to vector<1x256xi32>
      %380 = arith.select %377, %379, %375 : vector<1x256xi1>, vector<1x256xi32>
      %381 = vector.extract_strided_slice %353 {offsets = [6, 0], sizes = [1, 256], strides = [1, 1]} : vector<8x256xf32> to vector<1x256xf32>
      %382 = arith.cmpf ogt, %381, %378 : vector<1x256xf32>
      %383 = arith.select %382, %381, %378 : vector<1x256xi1>, vector<1x256xf32>
      %c6_i32 = arith.constant 6 : i32
      %384 = vector.broadcast %c6_i32 : i32 to vector<1x256xi32>
      %385 = arith.select %382, %384, %380 : vector<1x256xi1>, vector<1x256xi32>
      %386 = vector.extract_strided_slice %353 {offsets = [7, 0], sizes = [1, 256], strides = [1, 1]} : vector<8x256xf32> to vector<1x256xf32>
      %387 = arith.cmpf ogt, %386, %383 : vector<1x256xf32>
      %c7_i32 = arith.constant 7 : i32
      %388 = vector.broadcast %c7_i32 : i32 to vector<1x256xi32>
      %389 = arith.select %387, %388, %385 : vector<1x256xi1>, vector<1x256xi32>
      %390 = vector.broadcast %389 : vector<1x256xi32> to vector<8x256xi32>
      %391 = arith.cmpi eq, %390, %2 : vector<8x256xi32>
      %392 = arith.extui %391 : vector<8x256xi1> to vector<8x256xi32>
      %393 = arith.sitofp %392 : vector<8x256xi32> to vector<8x256xf32>
      %cst_118 = arith.constant dense<0.000000e+00> : vector<8xf32>
      %394 = vector.multi_reduction <add>, %393, %cst_118 [1] : vector<8x256xf32> to vector<8xf32>
      %395 = vector.shape_cast %394 : vector<8xf32> to vector<8x1xf32>
      %cst_119 = arith.constant dense<0.000000e+00> : vector<8x3xf32>
      %396 = tpu.matmul %393, %1, %cst_119 {dimension_numbers = #tpu.dot_dimension_numbers<[1], [1], [0], [0], [0, 0, 1, 0], [], []>} : vector<8x256xf32>, vector<3x256xf32>, vector<8x3xf32> -> vector<8x3xf32>
      %cst_120 = arith.constant 9.99999993E-9 : f32
      %397 = vector.broadcast %cst_120 : f32 to vector<8x1xf32>
      %398 = arith.addf %395, %397 : vector<8x1xf32>
      %399 = vector.broadcast %398 : vector<8x1xf32> to vector<8x3xf32>
      %400 = arith.divf %396, %399 : vector<8x3xf32>
      %401 = arith.subf %400, %arg8 : vector<8x3xf32>
      %402 = arith.mulf %401, %401 : vector<8x3xf32>
      %403 = vector.shape_cast %402 : vector<8x3xf32> to vector<1x8x3xf32>
      %cst_121 = arith.constant dense<0.000000e+00> : vector<1xf32>
      %404 = vector.multi_reduction <add>, %403, %cst_121 [1, 2] : vector<1x8x3xf32> to vector<1xf32>
      %405 = vector.shape_cast %404 : vector<1xf32> to vector<1x1x1xf32>
      %406 = vector.extract %405[0, 0, 0] : f32 from vector<1x1x1xf32>
      %407 = vector.broadcast %406 : f32 to vector<1x1xf32>
      %cst_122 = arith.constant 9.99999974E-5 : f32
      %408 = vector.broadcast %cst_122 : f32 to vector<1x1xf32>
      %409 = arith.cmpf ogt, %arg10, %408 : vector<1x1xf32>
      %410 = vector.shape_cast %409 : vector<1x1xi1> to vector<1x1xi1>
      %411 = vector.broadcast %410 : vector<1x1xi1> to vector<8x3xi1>
      %412 = arith.select %411, %400, %arg8 : vector<8x3xi1>, vector<8x3xf32>
      %413 = vector.shape_cast %409 : vector<1x1xi1> to vector<1x1xi1>
      %414 = vector.broadcast %413 : vector<1x1xi1> to vector<1x256xi1>
      %415 = arith.select %414, %389, %arg9 : vector<1x256xi1>, vector<1x256xi32>
      %416 = arith.select %409, %407, %arg10 : vector<1x1xi1>, vector<1x1xf32>
      scf.yield %412, %415, %416 : vector<8x3xf32>, vector<1x256xi32>, vector<1x1xf32>
    }
    %c0_6 = arith.constant 0 : index
    %c0_7 = arith.constant 0 : index
    %c0_8 = arith.constant 0 : index
    %9 = vector.load %arg4[%c0_6, %c0_7, %c0_8] : memref<1x8x3xf32, #tpu.memory_space<vmem>>, vector<1x8x3xf32>
    %10 = vector.shape_cast %9 : vector<1x8x3xf32> to vector<8x3xf32>
    %11 = vector.shape_cast %8#0 : vector<8x3xf32> to vector<1x8x3xf32>
    tpu.vector_store %arg4[%c0_6, %c0_7, %c0_8], %11 {strides = array<i32>} : memref<1x8x3xf32, #tpu.memory_space<vmem>>, vector<1x8x3xf32>,
    %c0_9 = arith.constant 0 : index
    %c0_10 = arith.constant 0 : index
    %c0_11 = arith.constant 0 : index
    %12 = vector.load %arg6[%c0_9, %c0_10, %c0_11] : memref<1x1x256xi32, #tpu.memory_space<vmem>>, vector<1x1x256xi32>
    %13 = vector.shape_cast %12 : vector<1x1x256xi32> to vector<1x256xi32>
    %14 = vector.shape_cast %8#1 : vector<1x256xi32> to vector<1x1x256xi32>
    tpu.vector_store %arg6[%c0_9, %c0_10, %c0_11], %14 {strides = array<i32>} : memref<1x1x256xi32, #tpu.memory_space<vmem>>, vector<1x1x256xi32>,
    %c0_12 = arith.constant 0 : index
    %c0_13 = arith.constant 0 : index
    %c0_14 = arith.constant 0 : index
    %15 = vector.load %arg2[%c0_12, %c0_13, %c0_14] : memref<1x16x256xf32, #tpu.memory_space<vmem>>, vector<1x16x256xf32>
    %16 = vector.shape_cast %15 : vector<1x16x256xf32> to vector<16x256xf32>
    %17 = tpu.iota {dimensions = array<i32: 1>} : vector<8x256xi32>
    %18 = vector.extract_strided_slice %1 {offsets = [0, 0], sizes = [1, 256], strides = [1, 1]} : vector<3x256xf32> to vector<1x256xf32>
    %19 = vector.extract_strided_slice %8#0 {offsets = [0, 0], sizes = [8, 1], strides = [1, 1]} : vector<8x3xf32> to vector<8x1xf32>
    %20 = vector.broadcast %18 : vector<1x256xf32> to vector<8x256xf32>
    %21 = vector.broadcast %19 : vector<8x1xf32> to vector<8x256xf32>
    %22 = arith.subf %20, %21 : vector<8x256xf32>
    %23 = arith.mulf %22, %22 : vector<8x256xf32>
    %24 = vector.extract_strided_slice %1 {offsets = [1, 0], sizes = [1, 256], strides = [1, 1]} : vector<3x256xf32> to vector<1x256xf32>
    %25 = vector.extract_strided_slice %8#0 {offsets = [0, 1], sizes = [8, 1], strides = [1, 1]} : vector<8x3xf32> to vector<8x1xf32>
    %26 = vector.broadcast %24 : vector<1x256xf32> to vector<8x256xf32>
    %27 = vector.broadcast %25 : vector<8x1xf32> to vector<8x256xf32>
    %28 = arith.subf %26, %27 : vector<8x256xf32>
    %29 = arith.mulf %28, %28 : vector<8x256xf32>
    %30 = arith.addf %23, %29 : vector<8x256xf32>
    %31 = vector.extract_strided_slice %1 {offsets = [2, 0], sizes = [1, 256], strides = [1, 1]} : vector<3x256xf32> to vector<1x256xf32>
    %32 = vector.extract_strided_slice %8#0 {offsets = [0, 2], sizes = [8, 1], strides = [1, 1]} : vector<8x3xf32> to vector<8x1xf32>
    %33 = vector.broadcast %31 : vector<1x256xf32> to vector<8x256xf32>
    %34 = vector.broadcast %32 : vector<8x1xf32> to vector<8x256xf32>
    %35 = arith.subf %33, %34 : vector<8x256xf32>
    %36 = arith.mulf %35, %35 : vector<8x256xf32>
    %37 = arith.addf %30, %36 : vector<8x256xf32>
    %cst_15 = arith.constant 0.000000e+00 : f32
    %38 = vector.broadcast %cst_15 : f32 to vector<8x256xf32>
    %39 = arith.subf %38, %37 : vector<8x256xf32>
    %40 = vector.broadcast %8#1 : vector<1x256xi32> to vector<8x256xi32>
    %41 = arith.cmpi eq, %40, %2 : vector<8x256xi32>
    %cst_16 = arith.constant 0xFF800000 : f32
    %42 = vector.broadcast %cst_16 : f32 to vector<8x256xf32>
    %43 = arith.select %41, %39, %42 : vector<8x256xi1>, vector<8x256xf32>
    %cst_17 = arith.constant 0.000000e+00 : f32
    %44 = vector.broadcast %cst_17 : f32 to vector<8x256xf32>
    %cst_18 = arith.constant dense<0xFF800000> : vector<8xf32>
    %45 = vector.multi_reduction <maximumf>, %43, %cst_18 [1] : vector<8x256xf32> to vector<8xf32>
    %46 = vector.shape_cast %45 : vector<8xf32> to vector<8x1xf32>
    %47 = vector.broadcast %46 : vector<8x1xf32> to vector<8x256xf32>
    %48 = arith.cmpf oeq, %43, %47 : vector<8x256xf32>
    %c256_i32 = arith.constant 256 : i32
    %49 = vector.broadcast %c256_i32 : i32 to vector<8x256xi32>
    %50 = arith.select %48, %17, %49 : vector<8x256xi1>, vector<8x256xi32>
    %cst_19 = arith.constant dense<2147483647> : vector<8xi32>
    %51 = vector.multi_reduction <minsi>, %50, %cst_19 [1] : vector<8x256xi32> to vector<8xi32>
    %52 = vector.shape_cast %51 : vector<8xi32> to vector<8x1xi32>
    %53 = vector.broadcast %52 : vector<8x1xi32> to vector<8x256xi32>
    %54 = arith.cmpi eq, %17, %53 : vector<8x256xi32>
    %cst_20 = arith.constant 0xFF800000 : f32
    %55 = vector.broadcast %cst_20 : f32 to vector<8x1xf32>
    %56 = arith.cmpf ogt, %46, %55 : vector<8x1xf32>
    %57 = vector.broadcast %56 : vector<8x1xi1> to vector<8x256xi1>
    %58 = arith.andi %54, %57 : vector<8x256xi1>
    %cst_21 = arith.constant 1.000000e+00 : f32
    %59 = vector.broadcast %cst_21 : f32 to vector<8x256xf32>
    %60 = arith.select %58, %59, %44 : vector<8x256xi1>, vector<8x256xf32>
    %cst_22 = arith.constant 0xFF800000 : f32
    %61 = vector.broadcast %cst_22 : f32 to vector<8x256xf32>
    %62 = arith.select %58, %61, %43 : vector<8x256xi1>, vector<8x256xf32>
    %cst_23 = arith.constant dense<0xFF800000> : vector<8xf32>
    %63 = vector.multi_reduction <maximumf>, %62, %cst_23 [1] : vector<8x256xf32> to vector<8xf32>
    %64 = vector.shape_cast %63 : vector<8xf32> to vector<8x1xf32>
    %65 = vector.broadcast %64 : vector<8x1xf32> to vector<8x256xf32>
    %66 = arith.cmpf oeq, %62, %65 : vector<8x256xf32>
    %c256_i32_24 = arith.constant 256 : i32
    %67 = vector.broadcast %c256_i32_24 : i32 to vector<8x256xi32>
    %68 = arith.select %66, %17, %67 : vector<8x256xi1>, vector<8x256xi32>
    %cst_25 = arith.constant dense<2147483647> : vector<8xi32>
    %69 = vector.multi_reduction <minsi>, %68, %cst_25 [1] : vector<8x256xi32> to vector<8xi32>
    %70 = vector.shape_cast %69 : vector<8xi32> to vector<8x1xi32>
    %71 = vector.broadcast %70 : vector<8x1xi32> to vector<8x256xi32>
    %72 = arith.cmpi eq, %17, %71 : vector<8x256xi32>
    %cst_26 = arith.constant 0xFF800000 : f32
    %73 = vector.broadcast %cst_26 : f32 to vector<8x1xf32>
    %74 = arith.cmpf ogt, %64, %73 : vector<8x1xf32>
    %75 = vector.broadcast %74 : vector<8x1xi1> to vector<8x256xi1>
    %76 = arith.andi %72, %75 : vector<8x256xi1>
    %cst_27 = arith.constant 1.000000e+00 : f32
    %77 = vector.broadcast %cst_27 : f32 to vector<8x256xf32>
    %78 = arith.select %76, %77, %60 : vector<8x256xi1>, vector<8x256xf32>
    %cst_28 = arith.constant 0xFF800000 : f32
    %79 = vector.broadcast %cst_28 : f32 to vector<8x256xf32>
    %80 = arith.select %76, %79, %62 : vector<8x256xi1>, vector<8x256xf32>
    %cst_29 = arith.constant dense<0xFF800000> : vector<8xf32>
    %81 = vector.multi_reduction <maximumf>, %80, %cst_29 [1] : vector<8x256xf32> to vector<8xf32>
    %82 = vector.shape_cast %81 : vector<8xf32> to vector<8x1xf32>
    %83 = vector.broadcast %82 : vector<8x1xf32> to vector<8x256xf32>
    %84 = arith.cmpf oeq, %80, %83 : vector<8x256xf32>
    %c256_i32_30 = arith.constant 256 : i32
    %85 = vector.broadcast %c256_i32_30 : i32 to vector<8x256xi32>
    %86 = arith.select %84, %17, %85 : vector<8x256xi1>, vector<8x256xi32>
    %cst_31 = arith.constant dense<2147483647> : vector<8xi32>
    %87 = vector.multi_reduction <minsi>, %86, %cst_31 [1] : vector<8x256xi32> to vector<8xi32>
    %88 = vector.shape_cast %87 : vector<8xi32> to vector<8x1xi32>
    %89 = vector.broadcast %88 : vector<8x1xi32> to vector<8x256xi32>
    %90 = arith.cmpi eq, %17, %89 : vector<8x256xi32>
    %cst_32 = arith.constant 0xFF800000 : f32
    %91 = vector.broadcast %cst_32 : f32 to vector<8x1xf32>
    %92 = arith.cmpf ogt, %82, %91 : vector<8x1xf32>
    %93 = vector.broadcast %92 : vector<8x1xi1> to vector<8x256xi1>
    %94 = arith.andi %90, %93 : vector<8x256xi1>
    %cst_33 = arith.constant 1.000000e+00 : f32
    %95 = vector.broadcast %cst_33 : f32 to vector<8x256xf32>
    %96 = arith.select %94, %95, %78 : vector<8x256xi1>, vector<8x256xf32>
    %cst_34 = arith.constant 0xFF800000 : f32
    %97 = vector.broadcast %cst_34 : f32 to vector<8x256xf32>
    %98 = arith.select %94, %97, %80 : vector<8x256xi1>, vector<8x256xf32>
    %cst_35 = arith.constant dense<0xFF800000> : vector<8xf32>
    %99 = vector.multi_reduction <maximumf>, %98, %cst_35 [1] : vector<8x256xf32> to vector<8xf32>
    %100 = vector.shape_cast %99 : vector<8xf32> to vector<8x1xf32>
    %101 = vector.broadcast %100 : vector<8x1xf32> to vector<8x256xf32>
    %102 = arith.cmpf oeq, %98, %101 : vector<8x256xf32>
    %c256_i32_36 = arith.constant 256 : i32
    %103 = vector.broadcast %c256_i32_36 : i32 to vector<8x256xi32>
    %104 = arith.select %102, %17, %103 : vector<8x256xi1>, vector<8x256xi32>
    %cst_37 = arith.constant dense<2147483647> : vector<8xi32>
    %105 = vector.multi_reduction <minsi>, %104, %cst_37 [1] : vector<8x256xi32> to vector<8xi32>
    %106 = vector.shape_cast %105 : vector<8xi32> to vector<8x1xi32>
    %107 = vector.broadcast %106 : vector<8x1xi32> to vector<8x256xi32>
    %108 = arith.cmpi eq, %17, %107 : vector<8x256xi32>
    %cst_38 = arith.constant 0xFF800000 : f32
    %109 = vector.broadcast %cst_38 : f32 to vector<8x1xf32>
    %110 = arith.cmpf ogt, %100, %109 : vector<8x1xf32>
    %111 = vector.broadcast %110 : vector<8x1xi1> to vector<8x256xi1>
    %112 = arith.andi %108, %111 : vector<8x256xi1>
    %cst_39 = arith.constant 1.000000e+00 : f32
    %113 = vector.broadcast %cst_39 : f32 to vector<8x256xf32>
    %114 = arith.select %112, %113, %96 : vector<8x256xi1>, vector<8x256xf32>
    %cst_40 = arith.constant 0xFF800000 : f32
    %115 = vector.broadcast %cst_40 : f32 to vector<8x256xf32>
    %116 = arith.select %112, %115, %98 : vector<8x256xi1>, vector<8x256xf32>
    %cst_41 = arith.constant dense<0xFF800000> : vector<8xf32>
    %117 = vector.multi_reduction <maximumf>, %116, %cst_41 [1] : vector<8x256xf32> to vector<8xf32>
    %118 = vector.shape_cast %117 : vector<8xf32> to vector<8x1xf32>
    %119 = vector.broadcast %118 : vector<8x1xf32> to vector<8x256xf32>
    %120 = arith.cmpf oeq, %116, %119 : vector<8x256xf32>
    %c256_i32_42 = arith.constant 256 : i32
    %121 = vector.broadcast %c256_i32_42 : i32 to vector<8x256xi32>
    %122 = arith.select %120, %17, %121 : vector<8x256xi1>, vector<8x256xi32>
    %cst_43 = arith.constant dense<2147483647> : vector<8xi32>
    %123 = vector.multi_reduction <minsi>, %122, %cst_43 [1] : vector<8x256xi32> to vector<8xi32>
    %124 = vector.shape_cast %123 : vector<8xi32> to vector<8x1xi32>
    %125 = vector.broadcast %124 : vector<8x1xi32> to vector<8x256xi32>
    %126 = arith.cmpi eq, %17, %125 : vector<8x256xi32>
    %cst_44 = arith.constant 0xFF800000 : f32
    %127 = vector.broadcast %cst_44 : f32 to vector<8x1xf32>
    %128 = arith.cmpf ogt, %118, %127 : vector<8x1xf32>
    %129 = vector.broadcast %128 : vector<8x1xi1> to vector<8x256xi1>
    %130 = arith.andi %126, %129 : vector<8x256xi1>
    %cst_45 = arith.constant 1.000000e+00 : f32
    %131 = vector.broadcast %cst_45 : f32 to vector<8x256xf32>
    %132 = arith.select %130, %131, %114 : vector<8x256xi1>, vector<8x256xf32>
    %cst_46 = arith.constant 0xFF800000 : f32
    %133 = vector.broadcast %cst_46 : f32 to vector<8x256xf32>
    %134 = arith.select %130, %133, %116 : vector<8x256xi1>, vector<8x256xf32>
    %cst_47 = arith.constant dense<0xFF800000> : vector<8xf32>
    %135 = vector.multi_reduction <maximumf>, %134, %cst_47 [1] : vector<8x256xf32> to vector<8xf32>
    %136 = vector.shape_cast %135 : vector<8xf32> to vector<8x1xf32>
    %137 = vector.broadcast %136 : vector<8x1xf32> to vector<8x256xf32>
    %138 = arith.cmpf oeq, %134, %137 : vector<8x256xf32>
    %c256_i32_48 = arith.constant 256 : i32
    %139 = vector.broadcast %c256_i32_48 : i32 to vector<8x256xi32>
    %140 = arith.select %138, %17, %139 : vector<8x256xi1>, vector<8x256xi32>
    %cst_49 = arith.constant dense<2147483647> : vector<8xi32>
    %141 = vector.multi_reduction <minsi>, %140, %cst_49 [1] : vector<8x256xi32> to vector<8xi32>
    %142 = vector.shape_cast %141 : vector<8xi32> to vector<8x1xi32>
    %143 = vector.broadcast %142 : vector<8x1xi32> to vector<8x256xi32>
    %144 = arith.cmpi eq, %17, %143 : vector<8x256xi32>
    %cst_50 = arith.constant 0xFF800000 : f32
    %145 = vector.broadcast %cst_50 : f32 to vector<8x1xf32>
    %146 = arith.cmpf ogt, %136, %145 : vector<8x1xf32>
    %147 = vector.broadcast %146 : vector<8x1xi1> to vector<8x256xi1>
    %148 = arith.andi %144, %147 : vector<8x256xi1>
    %cst_51 = arith.constant 1.000000e+00 : f32
    %149 = vector.broadcast %cst_51 : f32 to vector<8x256xf32>
    %150 = arith.select %148, %149, %132 : vector<8x256xi1>, vector<8x256xf32>
    %cst_52 = arith.constant 0xFF800000 : f32
    %151 = vector.broadcast %cst_52 : f32 to vector<8x256xf32>
    %152 = arith.select %148, %151, %134 : vector<8x256xi1>, vector<8x256xf32>
    %cst_53 = arith.constant dense<0xFF800000> : vector<8xf32>
    %153 = vector.multi_reduction <maximumf>, %152, %cst_53 [1] : vector<8x256xf32> to vector<8xf32>
    %154 = vector.shape_cast %153 : vector<8xf32> to vector<8x1xf32>
    %155 = vector.broadcast %154 : vector<8x1xf32> to vector<8x256xf32>
    %156 = arith.cmpf oeq, %152, %155 : vector<8x256xf32>
    %c256_i32_54 = arith.constant 256 : i32
    %157 = vector.broadcast %c256_i32_54 : i32 to vector<8x256xi32>
    %158 = arith.select %156, %17, %157 : vector<8x256xi1>, vector<8x256xi32>
    %cst_55 = arith.constant dense<2147483647> : vector<8xi32>
    %159 = vector.multi_reduction <minsi>, %158, %cst_55 [1] : vector<8x256xi32> to vector<8xi32>
    %160 = vector.shape_cast %159 : vector<8xi32> to vector<8x1xi32>
    %161 = vector.broadcast %160 : vector<8x1xi32> to vector<8x256xi32>
    %162 = arith.cmpi eq, %17, %161 : vector<8x256xi32>
    %cst_56 = arith.constant 0xFF800000 : f32
    %163 = vector.broadcast %cst_56 : f32 to vector<8x1xf32>
    %164 = arith.cmpf ogt, %154, %163 : vector<8x1xf32>
    %165 = vector.broadcast %164 : vector<8x1xi1> to vector<8x256xi1>
    %166 = arith.andi %162, %165 : vector<8x256xi1>
    %cst_57 = arith.constant 1.000000e+00 : f32
    %167 = vector.broadcast %cst_57 : f32 to vector<8x256xf32>
    %168 = arith.select %166, %167, %150 : vector<8x256xi1>, vector<8x256xf32>
    %cst_58 = arith.constant 0xFF800000 : f32
    %169 = vector.broadcast %cst_58 : f32 to vector<8x256xf32>
    %170 = arith.select %166, %169, %152 : vector<8x256xi1>, vector<8x256xf32>
    %cst_59 = arith.constant dense<0xFF800000> : vector<8xf32>
    %171 = vector.multi_reduction <maximumf>, %170, %cst_59 [1] : vector<8x256xf32> to vector<8xf32>
    %172 = vector.shape_cast %171 : vector<8xf32> to vector<8x1xf32>
    %173 = vector.broadcast %172 : vector<8x1xf32> to vector<8x256xf32>
    %174 = arith.cmpf oeq, %170, %173 : vector<8x256xf32>
    %c256_i32_60 = arith.constant 256 : i32
    %175 = vector.broadcast %c256_i32_60 : i32 to vector<8x256xi32>
    %176 = arith.select %174, %17, %175 : vector<8x256xi1>, vector<8x256xi32>
    %cst_61 = arith.constant dense<2147483647> : vector<8xi32>
    %177 = vector.multi_reduction <minsi>, %176, %cst_61 [1] : vector<8x256xi32> to vector<8xi32>
    %178 = vector.shape_cast %177 : vector<8xi32> to vector<8x1xi32>
    %179 = vector.broadcast %178 : vector<8x1xi32> to vector<8x256xi32>
    %180 = arith.cmpi eq, %17, %179 : vector<8x256xi32>
    %cst_62 = arith.constant 0xFF800000 : f32
    %181 = vector.broadcast %cst_62 : f32 to vector<8x1xf32>
    %182 = arith.cmpf ogt, %172, %181 : vector<8x1xf32>
    %183 = vector.broadcast %182 : vector<8x1xi1> to vector<8x256xi1>
    %184 = arith.andi %180, %183 : vector<8x256xi1>
    %cst_63 = arith.constant 1.000000e+00 : f32
    %185 = vector.broadcast %cst_63 : f32 to vector<8x256xf32>
    %186 = arith.select %184, %185, %168 : vector<8x256xi1>, vector<8x256xf32>
    %cst_64 = arith.constant 0xFF800000 : f32
    %187 = vector.broadcast %cst_64 : f32 to vector<8x256xf32>
    %188 = arith.select %184, %187, %170 : vector<8x256xi1>, vector<8x256xf32>
    %cst_65 = arith.constant dense<0xFF800000> : vector<8xf32>
    %189 = vector.multi_reduction <maximumf>, %188, %cst_65 [1] : vector<8x256xf32> to vector<8xf32>
    %190 = vector.shape_cast %189 : vector<8xf32> to vector<8x1xf32>
    %191 = vector.broadcast %190 : vector<8x1xf32> to vector<8x256xf32>
    %192 = arith.cmpf oeq, %188, %191 : vector<8x256xf32>
    %c256_i32_66 = arith.constant 256 : i32
    %193 = vector.broadcast %c256_i32_66 : i32 to vector<8x256xi32>
    %194 = arith.select %192, %17, %193 : vector<8x256xi1>, vector<8x256xi32>
    %cst_67 = arith.constant dense<2147483647> : vector<8xi32>
    %195 = vector.multi_reduction <minsi>, %194, %cst_67 [1] : vector<8x256xi32> to vector<8xi32>
    %196 = vector.shape_cast %195 : vector<8xi32> to vector<8x1xi32>
    %197 = vector.broadcast %196 : vector<8x1xi32> to vector<8x256xi32>
    %198 = arith.cmpi eq, %17, %197 : vector<8x256xi32>
    %cst_68 = arith.constant 0xFF800000 : f32
    %199 = vector.broadcast %cst_68 : f32 to vector<8x1xf32>
    %200 = arith.cmpf ogt, %190, %199 : vector<8x1xf32>
    %201 = vector.broadcast %200 : vector<8x1xi1> to vector<8x256xi1>
    %202 = arith.andi %198, %201 : vector<8x256xi1>
    %cst_69 = arith.constant 1.000000e+00 : f32
    %203 = vector.broadcast %cst_69 : f32 to vector<8x256xf32>
    %204 = arith.select %202, %203, %186 : vector<8x256xi1>, vector<8x256xf32>
    %cst_70 = arith.constant 0xFF800000 : f32
    %205 = vector.broadcast %cst_70 : f32 to vector<8x256xf32>
    %206 = arith.select %202, %205, %188 : vector<8x256xi1>, vector<8x256xf32>
    %cst_71 = arith.constant dense<0xFF800000> : vector<8xf32>
    %207 = vector.multi_reduction <maximumf>, %206, %cst_71 [1] : vector<8x256xf32> to vector<8xf32>
    %208 = vector.shape_cast %207 : vector<8xf32> to vector<8x1xf32>
    %209 = vector.broadcast %208 : vector<8x1xf32> to vector<8x256xf32>
    %210 = arith.cmpf oeq, %206, %209 : vector<8x256xf32>
    %c256_i32_72 = arith.constant 256 : i32
    %211 = vector.broadcast %c256_i32_72 : i32 to vector<8x256xi32>
    %212 = arith.select %210, %17, %211 : vector<8x256xi1>, vector<8x256xi32>
    %cst_73 = arith.constant dense<2147483647> : vector<8xi32>
    %213 = vector.multi_reduction <minsi>, %212, %cst_73 [1] : vector<8x256xi32> to vector<8xi32>
    %214 = vector.shape_cast %213 : vector<8xi32> to vector<8x1xi32>
    %215 = vector.broadcast %214 : vector<8x1xi32> to vector<8x256xi32>
    %216 = arith.cmpi eq, %17, %215 : vector<8x256xi32>
    %cst_74 = arith.constant 0xFF800000 : f32
    %217 = vector.broadcast %cst_74 : f32 to vector<8x1xf32>
    %218 = arith.cmpf ogt, %208, %217 : vector<8x1xf32>
    %219 = vector.broadcast %218 : vector<8x1xi1> to vector<8x256xi1>
    %220 = arith.andi %216, %219 : vector<8x256xi1>
    %cst_75 = arith.constant 1.000000e+00 : f32
    %221 = vector.broadcast %cst_75 : f32 to vector<8x256xf32>
    %222 = arith.select %220, %221, %204 : vector<8x256xi1>, vector<8x256xf32>
    %cst_76 = arith.constant 0xFF800000 : f32
    %223 = vector.broadcast %cst_76 : f32 to vector<8x256xf32>
    %224 = arith.select %220, %223, %206 : vector<8x256xi1>, vector<8x256xf32>
    %cst_77 = arith.constant dense<0xFF800000> : vector<8xf32>
    %225 = vector.multi_reduction <maximumf>, %224, %cst_77 [1] : vector<8x256xf32> to vector<8xf32>
    %226 = vector.shape_cast %225 : vector<8xf32> to vector<8x1xf32>
    %227 = vector.broadcast %226 : vector<8x1xf32> to vector<8x256xf32>
    %228 = arith.cmpf oeq, %224, %227 : vector<8x256xf32>
    %c256_i32_78 = arith.constant 256 : i32
    %229 = vector.broadcast %c256_i32_78 : i32 to vector<8x256xi32>
    %230 = arith.select %228, %17, %229 : vector<8x256xi1>, vector<8x256xi32>
    %cst_79 = arith.constant dense<2147483647> : vector<8xi32>
    %231 = vector.multi_reduction <minsi>, %230, %cst_79 [1] : vector<8x256xi32> to vector<8xi32>
    %232 = vector.shape_cast %231 : vector<8xi32> to vector<8x1xi32>
    %233 = vector.broadcast %232 : vector<8x1xi32> to vector<8x256xi32>
    %234 = arith.cmpi eq, %17, %233 : vector<8x256xi32>
    %cst_80 = arith.constant 0xFF800000 : f32
    %235 = vector.broadcast %cst_80 : f32 to vector<8x1xf32>
    %236 = arith.cmpf ogt, %226, %235 : vector<8x1xf32>
    %237 = vector.broadcast %236 : vector<8x1xi1> to vector<8x256xi1>
    %238 = arith.andi %234, %237 : vector<8x256xi1>
    %cst_81 = arith.constant 1.000000e+00 : f32
    %239 = vector.broadcast %cst_81 : f32 to vector<8x256xf32>
    %240 = arith.select %238, %239, %222 : vector<8x256xi1>, vector<8x256xf32>
    %cst_82 = arith.constant 0xFF800000 : f32
    %241 = vector.broadcast %cst_82 : f32 to vector<8x256xf32>
    %242 = arith.select %238, %241, %224 : vector<8x256xi1>, vector<8x256xf32>
    %cst_83 = arith.constant dense<0xFF800000> : vector<8xf32>
    %243 = vector.multi_reduction <maximumf>, %242, %cst_83 [1] : vector<8x256xf32> to vector<8xf32>
    %244 = vector.shape_cast %243 : vector<8xf32> to vector<8x1xf32>
    %245 = vector.broadcast %244 : vector<8x1xf32> to vector<8x256xf32>
    %246 = arith.cmpf oeq, %242, %245 : vector<8x256xf32>
    %c256_i32_84 = arith.constant 256 : i32
    %247 = vector.broadcast %c256_i32_84 : i32 to vector<8x256xi32>
    %248 = arith.select %246, %17, %247 : vector<8x256xi1>, vector<8x256xi32>
    %cst_85 = arith.constant dense<2147483647> : vector<8xi32>
    %249 = vector.multi_reduction <minsi>, %248, %cst_85 [1] : vector<8x256xi32> to vector<8xi32>
    %250 = vector.shape_cast %249 : vector<8xi32> to vector<8x1xi32>
    %251 = vector.broadcast %250 : vector<8x1xi32> to vector<8x256xi32>
    %252 = arith.cmpi eq, %17, %251 : vector<8x256xi32>
    %cst_86 = arith.constant 0xFF800000 : f32
    %253 = vector.broadcast %cst_86 : f32 to vector<8x1xf32>
    %254 = arith.cmpf ogt, %244, %253 : vector<8x1xf32>
    %255 = vector.broadcast %254 : vector<8x1xi1> to vector<8x256xi1>
    %256 = arith.andi %252, %255 : vector<8x256xi1>
    %cst_87 = arith.constant 1.000000e+00 : f32
    %257 = vector.broadcast %cst_87 : f32 to vector<8x256xf32>
    %258 = arith.select %256, %257, %240 : vector<8x256xi1>, vector<8x256xf32>
    %cst_88 = arith.constant 0xFF800000 : f32
    %259 = vector.broadcast %cst_88 : f32 to vector<8x256xf32>
    %260 = arith.select %256, %259, %242 : vector<8x256xi1>, vector<8x256xf32>
    %cst_89 = arith.constant dense<0xFF800000> : vector<8xf32>
    %261 = vector.multi_reduction <maximumf>, %260, %cst_89 [1] : vector<8x256xf32> to vector<8xf32>
    %262 = vector.shape_cast %261 : vector<8xf32> to vector<8x1xf32>
    %263 = vector.broadcast %262 : vector<8x1xf32> to vector<8x256xf32>
    %264 = arith.cmpf oeq, %260, %263 : vector<8x256xf32>
    %c256_i32_90 = arith.constant 256 : i32
    %265 = vector.broadcast %c256_i32_90 : i32 to vector<8x256xi32>
    %266 = arith.select %264, %17, %265 : vector<8x256xi1>, vector<8x256xi32>
    %cst_91 = arith.constant dense<2147483647> : vector<8xi32>
    %267 = vector.multi_reduction <minsi>, %266, %cst_91 [1] : vector<8x256xi32> to vector<8xi32>
    %268 = vector.shape_cast %267 : vector<8xi32> to vector<8x1xi32>
    %269 = vector.broadcast %268 : vector<8x1xi32> to vector<8x256xi32>
    %270 = arith.cmpi eq, %17, %269 : vector<8x256xi32>
    %cst_92 = arith.constant 0xFF800000 : f32
    %271 = vector.broadcast %cst_92 : f32 to vector<8x1xf32>
    %272 = arith.cmpf ogt, %262, %271 : vector<8x1xf32>
    %273 = vector.broadcast %272 : vector<8x1xi1> to vector<8x256xi1>
    %274 = arith.andi %270, %273 : vector<8x256xi1>
    %cst_93 = arith.constant 1.000000e+00 : f32
    %275 = vector.broadcast %cst_93 : f32 to vector<8x256xf32>
    %276 = arith.select %274, %275, %258 : vector<8x256xi1>, vector<8x256xf32>
    %cst_94 = arith.constant 0xFF800000 : f32
    %277 = vector.broadcast %cst_94 : f32 to vector<8x256xf32>
    %278 = arith.select %274, %277, %260 : vector<8x256xi1>, vector<8x256xf32>
    %cst_95 = arith.constant dense<0xFF800000> : vector<8xf32>
    %279 = vector.multi_reduction <maximumf>, %278, %cst_95 [1] : vector<8x256xf32> to vector<8xf32>
    %280 = vector.shape_cast %279 : vector<8xf32> to vector<8x1xf32>
    %281 = vector.broadcast %280 : vector<8x1xf32> to vector<8x256xf32>
    %282 = arith.cmpf oeq, %278, %281 : vector<8x256xf32>
    %c256_i32_96 = arith.constant 256 : i32
    %283 = vector.broadcast %c256_i32_96 : i32 to vector<8x256xi32>
    %284 = arith.select %282, %17, %283 : vector<8x256xi1>, vector<8x256xi32>
    %cst_97 = arith.constant dense<2147483647> : vector<8xi32>
    %285 = vector.multi_reduction <minsi>, %284, %cst_97 [1] : vector<8x256xi32> to vector<8xi32>
    %286 = vector.shape_cast %285 : vector<8xi32> to vector<8x1xi32>
    %287 = vector.broadcast %286 : vector<8x1xi32> to vector<8x256xi32>
    %288 = arith.cmpi eq, %17, %287 : vector<8x256xi32>
    %cst_98 = arith.constant 0xFF800000 : f32
    %289 = vector.broadcast %cst_98 : f32 to vector<8x1xf32>
    %290 = arith.cmpf ogt, %280, %289 : vector<8x1xf32>
    %291 = vector.broadcast %290 : vector<8x1xi1> to vector<8x256xi1>
    %292 = arith.andi %288, %291 : vector<8x256xi1>
    %cst_99 = arith.constant 1.000000e+00 : f32
    %293 = vector.broadcast %cst_99 : f32 to vector<8x256xf32>
    %294 = arith.select %292, %293, %276 : vector<8x256xi1>, vector<8x256xf32>
    %cst_100 = arith.constant 0xFF800000 : f32
    %295 = vector.broadcast %cst_100 : f32 to vector<8x256xf32>
    %296 = arith.select %292, %295, %278 : vector<8x256xi1>, vector<8x256xf32>
    %cst_101 = arith.constant dense<0xFF800000> : vector<8xf32>
    %297 = vector.multi_reduction <maximumf>, %296, %cst_101 [1] : vector<8x256xf32> to vector<8xf32>
    %298 = vector.shape_cast %297 : vector<8xf32> to vector<8x1xf32>
    %299 = vector.broadcast %298 : vector<8x1xf32> to vector<8x256xf32>
    %300 = arith.cmpf oeq, %296, %299 : vector<8x256xf32>
    %c256_i32_102 = arith.constant 256 : i32
    %301 = vector.broadcast %c256_i32_102 : i32 to vector<8x256xi32>
    %302 = arith.select %300, %17, %301 : vector<8x256xi1>, vector<8x256xi32>
    %cst_103 = arith.constant dense<2147483647> : vector<8xi32>
    %303 = vector.multi_reduction <minsi>, %302, %cst_103 [1] : vector<8x256xi32> to vector<8xi32>
    %304 = vector.shape_cast %303 : vector<8xi32> to vector<8x1xi32>
    %305 = vector.broadcast %304 : vector<8x1xi32> to vector<8x256xi32>
    %306 = arith.cmpi eq, %17, %305 : vector<8x256xi32>
    %cst_104 = arith.constant 0xFF800000 : f32
    %307 = vector.broadcast %cst_104 : f32 to vector<8x1xf32>
    %308 = arith.cmpf ogt, %298, %307 : vector<8x1xf32>
    %309 = vector.broadcast %308 : vector<8x1xi1> to vector<8x256xi1>
    %310 = arith.andi %306, %309 : vector<8x256xi1>
    %cst_105 = arith.constant 1.000000e+00 : f32
    %311 = vector.broadcast %cst_105 : f32 to vector<8x256xf32>
    %312 = arith.select %310, %311, %294 : vector<8x256xi1>, vector<8x256xf32>
    %cst_106 = arith.constant dense<0xFF800000> : vector<8xf32>
    %313 = vector.multi_reduction <maximumf>, %43, %cst_106 [1] : vector<8x256xf32> to vector<8xf32>
    %314 = vector.shape_cast %313 : vector<8xf32> to vector<8x1xf32>
    %cst_107 = arith.constant 0.000000e+00 : f32
    %315 = vector.broadcast %cst_107 : f32 to vector<8x256xf32>
    %316 = arith.cmpf ogt, %312, %315 : vector<8x256xf32>
    %317 = vector.broadcast %314 : vector<8x1xf32> to vector<8x256xf32>
    %318 = arith.subf %43, %317 : vector<8x256xf32>
    %319 = math.exp %318 : vector<8x256xf32>
    %cst_108 = arith.constant 0.000000e+00 : f32
    %320 = vector.broadcast %cst_108 : f32 to vector<8x256xf32>
    %321 = arith.select %316, %319, %320 : vector<8x256xi1>, vector<8x256xf32>
    %cst_109 = arith.constant dense<0.000000e+00> : vector<8xf32>
    %322 = vector.multi_reduction <add>, %321, %cst_109 [1] : vector<8x256xf32> to vector<8xf32>
    %323 = vector.shape_cast %322 : vector<8xf32> to vector<8x1xf32>
    %cst_110 = arith.constant 9.99999968E-21 : f32
    %324 = vector.broadcast %cst_110 : f32 to vector<8x1xf32>
    %325 = arith.maximumf %323, %324 : vector<8x1xf32>
    %326 = vector.broadcast %325 : vector<8x1xf32> to vector<8x256xf32>
    %327 = arith.divf %321, %326 : vector<8x256xf32>
    %cst_111 = arith.constant dense<0.000000e+00> : vector<16x8xf32>
    %328 = tpu.matmul %16, %327, %cst_111 {dimension_numbers = #tpu.dot_dimension_numbers<[1], [1], [0], [0], [0, 0, 1, 0], [], []>} : vector<16x256xf32>, vector<8x256xf32>, vector<16x8xf32> -> vector<16x8xf32>
    %c0_112 = arith.constant 0 : index
    %c0_113 = arith.constant 0 : index
    %c0_114 = arith.constant 0 : index
    %329 = vector.load %arg5[%c0_112, %c0_113, %c0_114] : memref<1x16x8xf32, #tpu.memory_space<vmem>>, vector<1x16x8xf32>
    %330 = vector.shape_cast %329 : vector<1x16x8xf32> to vector<16x8xf32>
    %331 = vector.shape_cast %328 : vector<16x8xf32> to vector<1x16x8xf32>
    tpu.vector_store %arg5[%c0_112, %c0_113, %c0_114], %331 {strides = array<i32>} : memref<1x16x8xf32, #tpu.memory_space<vmem>>, vector<1x16x8xf32>,
    return
  }
  func.func @transform_0(%arg0: i32) -> (i32, i32, i32) {
    %c0_i32 = arith.constant 0 : i32
    %c0_i32_0 = arith.constant 0 : i32
    %c0_i32_1 = arith.constant 0 : i32
    return %arg0, %c0_i32, %c0_i32_0 : i32, i32, i32
  }
  func.func @transform_1(%arg0: i32) -> (i32, i32, i32) {
    %c0_i32 = arith.constant 0 : i32
    %c0_i32_0 = arith.constant 0 : i32
    %c0_i32_1 = arith.constant 0 : i32
    return %arg0, %c0_i32, %c0_i32_0 : i32, i32, i32
  }
  func.func @transform_2(%arg0: i32) -> (i32, i32, i32) {
    %c0_i32 = arith.constant 0 : i32
    %c0_i32_0 = arith.constant 0 : i32
    %c0_i32_1 = arith.constant 0 : i32
    return %arg0, %c0_i32, %c0_i32_0 : i32, i32, i32
  }
  func.func @transform_3(%arg0: i32) -> (i32, i32, i32) {
    %c0_i32 = arith.constant 0 : i32
    %c0_i32_0 = arith.constant 0 : i32
    %c0_i32_1 = arith.constant 0 : i32
    return %arg0, %c0_i32, %c0_i32_0 : i32, i32, i32
  }
  func.func @transform_4(%arg0: i32) -> (i32, i32, i32) {
    %c0_i32 = arith.constant 0 : i32
    %c0_i32_0 = arith.constant 0 : i32
    %c0_i32_1 = arith.constant 0 : i32
    return %arg0, %c0_i32, %c0_i32_0 : i32, i32, i32
  }
  func.func @transform_5(%arg0: i32) -> (i32, i32, i32) {
    %c0_i32 = arith.constant 0 : i32
    %c0_i32_0 = arith.constant 0 : i32
    %c0_i32_1 = arith.constant 0 : i32
    return %arg0, %c0_i32, %c0_i32_0 : i32, i32, i32
  }
}

</mosaic_0001>

<bundles_post_ra>
// kernel: run.1
= control target key start
LH: loop header
LB: loop body
LE: loop exit
PB: predicated region body
PF: predicated region fallthrough
CT: control target
= control target key end

     0   :  { %11 = vsyncpa [#allocation3], 0  ;;  %s2342_s0 = inlined_call_operand.vmem [shape: f32[2,3,256], index: 0, kind: input, shape index: {}]   ;;  %s2343_s1 = inlined_call_operand.hbm [shape: f32[2,16,256], index: 1, kind: input, shape index: {}]   ;;  %s2344_s2 = inlined_call_operand.vmem [shape: f32[2,8,3], index: 2, kind: input, shape index: {}]   ;;  %s2345_s3 = inlined_call_operand.vmem [shape: f32[2,8,3], index: 3, kind: output, shape index: {0}]   ;;  %s2346_s4 = inlined_call_operand.vmem [shape: f32[2,16,8], index: 4, kind: output, shape index: {1}]   ;;  %s2347_s5 = inlined_call_operand.vmem [shape: s32[2,1,256], index: 5, kind: output, shape index: {2}]  }
   0x1   :  { %13 = vsyncpa [#allocation3 + $0x1], 0  ;;  %s1796_s18 = smov 0   ;;  %s1798_s19 = smov 0  }
   0x2   :  { %s1800_s20 = smov 0   ;;  %s1802_s21 = smov 0  }
   0x3 LB: > { %s1815_s22 = sadd.s32 4294967295, %s1731_s21   ;;  %s1818_s23 = sadd.s32 1, %s1731_s21   ;;  %s1731_s21 = sphi %s1802_s21, %s2391_s21   ;;  %s1727_s20 = sphi %s1800_s20, %s2390_s20   ;;  %s1723_s19 = sphi %s1798_s19, %s2389_s19   ;;  %s1719_s18 = sphi %s1796_s18, %s2388_s18  }
   0x4   : > { %s49_s24 = ssub.s32 %s1731_s21, %s1818_s23  ;;  %s52_s25 = sadd.s32 1, %s1727_s20 }
   0x5   : > { %p50_p0 = scmp.eq.s32.totalorder %s49_s24, 0  ;;  %p59_p1 = scmp.ne.s32.totalorder %s1727_s20, %s1723_s19 }
   0x6   : > { %p60_p2 = scmp.eq.s32.totalorder %s1731_s21, 0  ;;  %p65_p3 = scmp.ne.s32.totalorder %s1723_s19, %s1719_s18 }
   0x7   : > { %s1828_s26 = scalar_select %p50_p0, %s1727_s20, %s52_s25  }
   0x8   : > { %p61_p4 = por %p60_p2, %p59_p1  ;;  %p66_p5 = scmp.eq.s32.totalorder %s1815_s22, 0 }
   0x9   : > { %p1546_p6 = scmp.lt.s32.totalorder %s1731_s21, 2  ;;  %s201_s28 = sand.u32 1, %s1727_s20  }
   0xa   : > { %p1832_p7 = por %p66_p5, %p65_p3  ;;  %s1515_s29 = sshll.u32 %s201_s28, 5 }
   0xb   : > { %s1533_s30 = sshll.u32 %s1731_s21, 9  ;;  %s205_s9 = scalar_lea.vmem [#allocation2], %s1515_s29 }
   0xc   : > { %s1841_s8 = scalar_lea.hbm %s2343_s1, %s1533_s30  ;;  %s212_s10 = sshll.u32 %s205_s9, 4  ;;  %s1843_s10 = int_to_ptr.vmem [resolvable:$true] %s212_s10 }
   0xd   : > { %p1845_p8 = pnand %p1546_p6, %p61_p4  ;;  %s1850_s12 = scalar_lea.sflag [#allocation3], %s201_s28 }
   0xe   : > { %s1647_s13 = scalar_lea.hbm %s1841_s8, 512  ;;  %s1652_s16 = scalar_lea.hbm %s2343_s1, 1024 }
   0xf   : > { %p1648_p10 = scmp.ne.s32.totalorder %s1841_s8, %s1647_s13  ;;  %p1649_p11 = pneg %p1845_p8 }
  0x10   : > { %p1653_p0 = scmp.lt.u32.totalorder %s1841_s8, %s2343_s1  ;;  %p1654_p1 = scmp.lt.u32.totalorder %s1652_s16, %s1647_s13 }
  0x11   : > { %p1650_p12 = pnand %p1649_p11, %p1648_p10  ;;  %p1656_p3 = scmp.lt.u32.totalorder %s1647_s13, %s1841_s8 }
  0x12   : > { %p1655_p2 = por %p1654_p1, %p1653_p0 }
  0x13   : > { %p1651_p13 = pneg %p1650_p12 }
  0x14   : > { %p1657_p4 = por %p1656_p3, %p1655_p2 }
  0x16   : > { %p1658_p5 = pnand %p1657_p4, %p1651_p13 }
  0x18   : > { %1661 = shalt.err (!%p1658_p5)
}
  0x19   : > { %s1662_s24 = scalar_lea.vmem %s1843_s10, 512  ;;  %s1753_s25 = smov [#allocation2]  }
  0x1a   : > { %p1663_p6 = scmp.ne.s32.totalorder %s1843_s10, %s1662_s24  ;;  %s1667_s28 = sshll.u32 %s1753_s25, 4  ;;  %s1668_s28 = int_to_ptr.vmem [resolvable:$false] %s1667_s28 }
  0x1b   : > { %s1669_s29 = scalar_lea.vmem %s1668_s28, 1024  ;;  %p1670_p9 = scmp.lt.s32.totalorder %s1843_s10, %s1668_s28 }
  0x1c   : > { %p1665_p10 = pnand %p1663_p6, %p1649_p11  ;;  %p1671_p0 = scmp.lt.s32.totalorder %s1669_s29, %s1662_s24 }
  0x1e   : > { %p1666_p12 = pneg %p1665_p10  ;;  %p1672_p1 = por %p1671_p0, %p1670_p9 }
  0x20   : > { %p1673_p2 = pnand %p1672_p1, %p1666_p12 }
  0x22   : > { %1676 = shalt.err (!%p1673_p2)
}
  0x23   : > { %s1754_s30 = smov 256   ;;  %s1755_s6 = smov 16  }
  0x24   : > { %1545 = dma.hbm_to_vmem [thread:$0]  (!%p1845_p8), %s1841_s8, 512, %s1843_s10, %s1850_s12, %s1754_s30, %s1754_s30, %s1755_s6  }
  0x25   : > { %p227_p11 = scmp.lt.s32.totalorder %s1731_s21, 3  ;;  %p2350_p13 = scmp.ge.s32.totalorder %s1731_s21, 1 }
  0x27   : > { %p228_p3 = pnand %p2350_p13, %p227_p11 }
  0x28   : > { %s233_s7 = sand.u32 (!%p228_p3), 1, %s1723_s19  }
  0x29   : > { %231 = sbr.rel (%p228_p3) target bundleno = 7738 (0x1e3a), region = 32  ;;  %s1519_s9 = sshll.u32 (!%p228_p3), %s233_s7, 5 }
  0x2a   : > { %s234_s13 = scalar_lea.sflag (!%p228_p3), [#allocation3], %s233_s7  ;;  %s1882_s14 = scalar_lea.vmem (!%p228_p3), [#allocation2], %s1519_s9 }
  0x30   : > { %1714 = dma.done.wait (%p1832_p7), %s234_s13, 512  }
  0x31   : > { %1716 = vsyncadd (%p1832_p7), %s234_s13, 4294966784  ;;  %p281_p9 = scmp.lt.s32.totalorder %s1815_s22, 1  ;;  %v304_v0 = vlaneseq  ;;  %v1919_v4 = vmov 1e+30   ;;  %v1921_v5 = vmov 0   ;;  %v1923_v6 = vmov 0  }
  0x32   : > { %s1927_s13 = smov 0  }
  0x33   : > { %s2393_s22 = smov (!%p281_p9, %s1815_s22), 1  ;;  %v1891_v1 = vshrl.u32 %v304_v0, 7 }
  0x34   : > { %s1893_s21 = sshll.u32 %s2393_s22, 3  ;;  %s1535_s8 = sshll.u32 %s2393_s22, 4 }
  0x35   : > { %s285_s12 = scalar_lea.vmem %s2342_s0, %s1893_s21  ;;  %s289_s16 = scalar_lea.vmem %s2344_s2, %s1893_s21 }
  0x36   : > { %s293_s24 = scalar_lea.vmem %s2345_s3, %s1893_s21  ;;  %s1910_s29 = scalar_lea.vmem %s2346_s4, %s1535_s8  ;;  %v1912_v2 = vld [vmem:[%s285_s12] sm:$0x77] }
  0x37   : > { %s1526_s30 = sshll.u32 %s2393_s22, 1  ;;  %v306_v3 = vld [vmem:[%s289_s16] sm:$0xff]  }
  0x38   : > { %s1917_s9 = scalar_lea.vmem %s2347_s5, %s1526_s30 }
  0x39 LB: >> { %v1756_v7 = vmov 0   ;;  %v1757_v8 = vmov 2   ;;  %v1758_v9 = vmov 1   ;;  %v514_v10 = vcombine.high %v1912_v2, %v1912_v2  ;;  %s312_s13 = sadd.s32 1, %s1751_s13   ;;  %s1751_s13 = sphi %s1927_s13, %s312_s13   ;;  %v1747_v3 = vphi %v306_v3, %v2355_v3   ;;  %v1743_v6 = vphi %v1923_v6, %v2354_v6   ;;  %v1739_v5 = vphi %v1921_v5, %v2353_v5   ;;  %v1735_v4 = vphi %v1919_v4, %v609_v4  }
  0x3a   : >> { %1631 = vset.pattern.permute.xlu0 %v1756_v7  ;;  %1633 = vset.pattern.permute.xlu1 %v1757_v8  ;;  %v320_v11 = vsub.s32 0, %v1891_v1  ;;  %v324_v12 = vsub.s32 4, %v1891_v1  ;;  %v375_v13 = vsub.s32 2, %v1891_v1  ;;  %v379_v14 = vsub.s32 6, %v1891_v1  ;;  %p309_p7 = scmp.ge.s32.totalorder %s312_s13, 50  }
  0x3b   : >> { %338 = vperm.xlu0 %1631, %v1747_v3   ;;  %392 = vperm.xlu1 %1633, %v1747_v3   ;;  %v347_v15 = vsub.s32 1, %v1891_v1  ;;  %v351_v16 = vsub.s32 5, %v1891_v1  ;;  %vm603_vm12 = vcmp.gt.f32.partialorder %v1735_v4, 0.0001 }
  0x3c   : >> { %516 = vmatprep.subr.mxu0 %v514_v10  ;;  %v321_v17 = vrot.slane %v1912_v2, %v320_v11  ;;  %v325_v18 = vrot.slane %v1912_v2, %v324_v12  ;;  %v376_v19 = vrot.slane %v1912_v2, %v375_v13  ;;  %v380_v20 = vrot.slane %v1912_v2, %v379_v14 }
  0x3d   : >> { %517 = vmatpush1.xpose.msra.mxu0 %v1912_v2  ;;  %v348_v21 = vrot.slane %v1912_v2, %v347_v15  ;;  %v352_v22 = vrot.slane %v1912_v2, %v351_v16 }
  0x3e   : >> { %v1962_v23 = vrot.slane %v321_v17, %v320_v11  ;;  %v1964_v24 = vrot.slane %v325_v18, %v320_v11  ;;  %v1966_v26 = vrot.slane %v376_v19, %v375_v13  ;;  %v1968_v27 = vrot.slane %v380_v20, %v375_v13 }
  0x3f   : >> { %1632 = vset.pattern.permute.xlu0 %v1758_v9  ;;  %v1970_v29 = vrot.slane %v348_v21, %v347_v15  ;;  %v1972_v30 = vrot.slane %v352_v22, %v347_v15 }
  0x40   : >> { %364 = vperm.xlu0 %1632, %v1747_v3  }
  0x44   : >> { %1634 = vset.pattern.permute.xlu0 %v1757_v8 }
  0xba   : >> { %v339_v25 = vpop.permute.xlu0 %338  ;;  %v393_v28 = vpop.permute.xlu1 %392 }
  0xbb   : >> { %v341_v31 = vsub.f32 %v1962_v23, %v339_v25  ;;  %v342_v32 = vsub.f32 %v1964_v24, %v339_v25  ;;  %v395_v33 = vsub.f32 %v1966_v26, %v393_v28  ;;  %v396_v34 = vsub.f32 %v1968_v27, %v393_v28 }
  0xbd   : >> { %v343_v38 = vmul.f32 %v341_v31, %v341_v31  ;;  %v344_v39 = vmul.f32 %v342_v32, %v342_v32  ;;  %v397_v42 = vmul.f32 %v395_v33, %v395_v33  ;;  %v398_v43 = vmul.f32 %v396_v34, %v396_v34 }
  0xbf   : >> { %v365_v35 = vpop.permute.xlu0 %364 }
  0xc0   : >> { %v367_v36 = vsub.f32 %v1970_v29, %v365_v35  ;;  %v368_v37 = vsub.f32 %v1972_v30, %v365_v35 }
  0xc2   : >> { %v369_v40 = vmul.f32 %v367_v36, %v367_v36  ;;  %v370_v41 = vmul.f32 %v368_v37, %v368_v37 }
  0xc4   : >> { %v371_v44 = vadd.f32 %v369_v40, %v343_v38  ;;  %v372_v45 = vadd.f32 %v370_v41, %v344_v39  ;;  %v2008_v41 = vsub.s32 7, %v1891_v1 }
  0xc6   : >> { %v399_v46 = vadd.f32 %v397_v42, %v371_v44  ;;  %v400_v47 = vadd.f32 %v398_v43, %v372_v45 }
  0xc8   : >> { %v1980_v48 = vsub.f32 0.0, %v399_v46  ;;  %v1982_v49 = vsub.f32 0.0, %v400_v47 }
  0xca   : >> { %v406_v50 = vrot.slane %v1982_v49, 7  ;;  %v405_v51 = vrot.slane %v1980_v48, 7 }
  0xcc   : >> { %vm410_vm0 = vcmp.gt.f32.partialorder %v1982_v49, %v406_v50  ;;  %vm409_vm1 = vcmp.gt.f32.partialorder %v1980_v48, %v405_v51 }
  0xcd   : >> { %v412_v52 = vsel %vm410_vm0, %v1982_v49, %v406_v50  ;;  %v414_v53 = vsel %vm410_vm0, 1, %v1756_v7  ;;  %v411_v54 = vsel %vm409_vm1, %v1980_v48, %v405_v51  ;;  %v413_v55 = vsel %vm409_vm1, 1, %v1756_v7 }
  0xce   : >> { %v418_v56 = vrot.slane %v412_v52, 7  ;;  %v426_v57 = vrot.slane %v414_v53, 7  ;;  %v417_v58 = vrot.slane %v411_v54, 7  ;;  %v425_v59 = vrot.slane %v413_v55, 7 }
  0xcf   : >> { %vm591_vm1 = vcmask 23552  }
  0xd0   : >> { %vm422_vm2 = vcmp.gt.f32.partialorder %v1982_v49, %v418_v56  ;;  %vm421_vm3 = vcmp.gt.f32.partialorder %v1980_v48, %v417_v58 }
  0xd1   : >> { %v424_v60 = vsel %vm422_vm2, %v1982_v49, %v418_v56  ;;  %v428_v61 = vsel %vm422_vm2, 2, %v426_v57  ;;  %v423_v62 = vsel %vm421_vm3, %v1980_v48, %v417_v58  ;;  %v427_v63 = vsel %vm421_vm3, 2, %v425_v59 }
  0xd2   : >> { %v432_v8 = vrot.slane %v424_v60, 7  ;;  %v440_v9 = vrot.slane %v428_v61, 7  ;;  %v431_v10 = vrot.slane %v423_v62, 7  ;;  %v439_v11 = vrot.slane %v427_v63, 7 }
  0xd3   : >> { %v1760_v58 = vmov 1.0  }
  0xd4   : >> { %vm436_vm4 = vcmp.gt.f32.partialorder %v1982_v49, %v432_v8  ;;  %vm435_vm5 = vcmp.gt.f32.partialorder %v1980_v48, %v431_v10 }
  0xd5   : >> { %v438_v7 = vsel %vm436_vm4, %v1982_v49, %v432_v8  ;;  %v442_v12 = vsel %vm436_vm4, 3, %v440_v9  ;;  %v437_v13 = vsel %vm435_vm5, %v1980_v48, %v431_v10  ;;  %v441_v14 = vsel %vm435_vm5, 3, %v439_v11 }
  0xd6   : >> { %v446_v15 = vrot.slane %v438_v7, 7  ;;  %v454_v16 = vrot.slane %v442_v12, 7  ;;  %v445_v17 = vrot.slane %v437_v13, 7  ;;  %v453_v18 = vrot.slane %v441_v14, 7 }
  0xd8   : >> { %vm450_vm6 = vcmp.gt.f32.partialorder %v1982_v49, %v446_v15  ;;  %vm449_vm7 = vcmp.gt.f32.partialorder %v1980_v48, %v445_v17 }
  0xd9   : >> { %v452_v19 = vsel %vm450_vm6, %v1982_v49, %v446_v15  ;;  %v456_v20 = vsel %vm450_vm6, 4, %v454_v16  ;;  %v451_v21 = vsel %vm449_vm7, %v1980_v48, %v445_v17  ;;  %v455_v22 = vsel %vm449_vm7, 4, %v453_v18 }
  0xda   : >> { %v460_v25 = vrot.slane %v452_v19, 7  ;;  %v468_v28 = vrot.slane %v456_v20, 7  ;;  %v459_v31 = vrot.slane %v451_v21, 7  ;;  %v467_v32 = vrot.slane %v455_v22, 7 }
  0xdb   : > { %v1762_v20 = vmov (%p309_p7), 2   ;;  %v1763_v21 = vmov (%p309_p7), 1  }
  0xdc   : >> { %vm464_vm8 = vcmp.gt.f32.partialorder %v1982_v49, %v460_v25  ;;  %vm463_vm9 = vcmp.gt.f32.partialorder %v1980_v48, %v459_v31  ;;  %1639 = vset.pattern.permute.xlu1 (%p309_p7), %v1762_v20 }
  0xdd   : >> { %v466_v33 = vsel %vm464_vm8, %v1982_v49, %v460_v25  ;;  %v470_v34 = vsel %vm464_vm8, 5, %v468_v28  ;;  %v465_v35 = vsel %vm463_vm9, %v1980_v48, %v459_v31  ;;  %v469_v36 = vsel %vm463_vm9, 5, %v467_v32 }
  0xde   : >> { %v474_v37 = vrot.slane %v466_v33, 7  ;;  %v482_v38 = vrot.slane %v470_v34, 7  ;;  %v473_v39 = vrot.slane %v465_v35, 7  ;;  %v481_v40 = vrot.slane %v469_v36, 7 }
  0xe0   : >> { %vm478_vm10 = vcmp.gt.f32.partialorder %v1982_v49, %v474_v37  ;;  %vm477_vm11 = vcmp.gt.f32.partialorder %v1980_v48, %v473_v39 }
  0xe1   : >> { %v480_v42 = vsel %vm478_vm10, %v1982_v49, %v474_v37  ;;  %v484_v43 = vsel %vm478_vm10, 6, %v482_v38  ;;  %v479_v44 = vsel %vm477_vm11, %v1980_v48, %v473_v39  ;;  %v483_v45 = vsel %vm477_vm11, 6, %v481_v40 }
  0xe2   : >> { %v488_v46 = vrot.slane %v480_v42, 7  ;;  %v494_v47 = vrot.slane %v484_v43, 7  ;;  %v487_v50 = vrot.slane %v479_v44, 7  ;;  %v493_v51 = vrot.slane %v483_v45, 7 }
  0xe4   : >> { %vm492_vm13 = vcmp.gt.f32.partialorder %v1982_v49, %v488_v46  ;;  %vm491_vm14 = vcmp.gt.f32.partialorder %v1980_v48, %v487_v50  ;;  %v1759_v48 = vmov 0.0  }
  0xe5   : >> { %v496_v52 = vsel %vm492_vm13, 7, %v494_v47  ;;  %v495_v53 = vsel %vm491_vm14, 7, %v493_v51 }
  0xe6   : >> { %v504_v54 = vrot.slane %v496_v52, %v2008_v41  ;;  %v2020_v5 = vsel %vm603_vm12, %v496_v52, %v1739_v5   ;;  %v500_v56 = vrot.slane %v495_v53, %v2008_v41  ;;  %v2026_v6 = vsel %vm603_vm12, %v495_v53, %v1743_v6  }
  0xe7   : >> { %v2351_v55 = vmov %v2020_v5  ;;  %v2352_v57 = vmov %v2026_v6 }
  0xe8   : >> { %vm506_vm15 = vcmp.eq.s32.totalorder %v504_v54, %v1891_v1  ;;  %vm505_vm0 = vcmp.eq.s32.totalorder %v500_v56, %v1891_v1 }
  0xe9   : >> { %v1528_v49 = vsel %vm506_vm15, 1.0, %v1759_v48  ;;  %1529 = vmatprep.mubr.msk.f32.mxu0 %vm506_vm15, %v1760_v58  ;;  %v1527_v59 = vsel %vm505_vm0, 1.0, %v1759_v48 }
  0xea   : >> { %1530 = vmatmul.mubr.msk.f32.vlgmr.msra.gmra.mrb[0].mxu0 %vm505_vm0, %v1760_v58  ;;  %v511_v60 = vadd.f32 %v1528_v49, %v1527_v59 }
  0xec   : >> { %512 = vadd.xlane.f32.xlu1 %v511_v60 }
 0x179   : >> { %v513_v5 = vpop.xlane.xlu1 %512 }
 0x17a   : >> { %v586_v61 = vadd.f32 1e-08, %v513_v5  ;;  %v2353_v5 = vmov %v2351_v55 }
 0x17c   : >> { %1635 = vrcp.f32 %v586_v61 }
 0x186   : >> { %v1636_v62 = vpop.eup %1635 }
 0x1bd   : >> { %v582_v63 = vpop.f32.mrb[0].mxu0 }
 0x1be   : >> { %v588_v8 = vmul.f32 %v1636_v62, %v582_v63  ;;  %v584_v9 = vpop.f32.mrb[1].mxu0 }
 0x1c0   : >> { %v589_v6 = vsub.f32 %v588_v8, %v1747_v3  ;;  %v606_v10 = vsel %vm603_vm12, %v588_v8, %v1747_v3  }
 0x1c1   : >> { %v2355_v3 = vmov %v606_v10  ;;  %611 = vst.msk [vmem:[%s293_s24] sm:$0xff] (%p309_p7), %vm591_vm1, %v606_v10  ;;  %716 = vperm.xlu1 (%p309_p7), %1639, %v606_v10  }
 0x1c2   : >> { %v590_v11 = vmul.f32 %v589_v6, %v589_v6  ;;  %v2354_v6 = vmov %v2352_v57  ;;  %v1761_v3 = vmov (%p309_p7), 0  }
 0x1c3   : > { %1637 = vset.pattern.permute.xlu0 (%p309_p7), %v1761_v3 }
 0x1c4   : >> { %v592_v7 = vsel %vm591_vm1, %v590_v11, 0.0 }
 0x1c5   : >> { %593 = vadd.xlane.f32.xlu0 %v592_v7 }
 0x1db   : > { %662 = vperm.xlu0 (%p309_p7), %1637, %v606_v10  }
 0x1df   : > { %1638 = vset.pattern.permute.xlu0 (%p309_p7), %v1763_v21 }
 0x1e0   : > { %688 = vperm.xlu0 (%p309_p7), %1638, %v606_v10  }
 0x1e4   : > { %1640 = vset.pattern.permute.xlu0 (%p309_p7), %v1762_v20 }
 0x240   : > { %v717_v25 = vpop.permute.xlu1 (%p309_p7), %716 }
 0x241   : > { %v719_v28 = vsub.f32 (%p309_p7), %v1966_v26, %v717_v25  ;;  %v720_v31 = vsub.f32 (%p309_p7), %v1968_v27, %v717_v25 }
 0x243   : > { %v721_v39 = vmul.f32 (%p309_p7), %v719_v28, %v719_v28  ;;  %v722_v40 = vmul.f32 (%p309_p7), %v720_v31, %v720_v31 }
 0x252   : >> { %v594_v12 = vpop.xlane.xlu0 %593 }
 0x253   : >> { %v595_v13 = vrot.slane %v594_v12, 4 }
 0x255   : >> { %v596_v14 = vadd.f32 %v595_v13, %v594_v12 }
 0x257   : >> { %v597_v15 = vrot.slane %v596_v14, 2 }
 0x259   : >> { %v598_v16 = vadd.f32 %v597_v15, %v596_v14 }
 0x25a   : > { %v663_v22 = vpop.permute.xlu0 (%p309_p7), %662 }
 0x25b   : >> { %v599_v17 = vrot.slane %v598_v16, 1  ;;  %v665_v2 = vsub.f32 (%p309_p7), %v1962_v23, %v663_v22  ;;  %v730_v23 = vrot.slane (%p309_p7), %v2352_v57, %v2008_v41 }
 0x25d   : >> { %v600_v18 = vadd.f32 %v599_v17, %v598_v16  ;;  %v667_v35 = vmul.f32 (%p309_p7), %v665_v2, %v665_v2  ;;  %vm735_vm2 = vcmp.eq.s32.totalorder (%p309_p7), %v730_v23, %v1891_v1 }
 0x25f   : >> { %1538 = vpush %v600_v18  ;;  %v689_v32 = vpop.permute.xlu0 (%p309_p7), %688 }
 0x260   : > { %v691_v33 = vsub.f32 (%p309_p7), %v1970_v29, %v689_v32  ;;  %v692_v34 = vsub.f32 (%p309_p7), %v1972_v30, %v689_v32 }
 0x262   : > { %v693_v37 = vmul.f32 (%p309_p7), %v691_v33, %v691_v33  ;;  %v694_v38 = vmul.f32 (%p309_p7), %v692_v34, %v692_v34 }
 0x264   : > { %v695_v26 = vadd.f32 (%p309_p7), %v693_v37, %v667_v35 }
 0x266   : > { %v723_v27 = vadd.f32 (%p309_p7), %v721_v39, %v695_v26 }
 0x268   : > { %v725_v29 = vsub.f32 (%p309_p7), 0.0, %v723_v27 }
 0x26a   : > { %v2069_v44 = vsel (%p309_p7), %vm735_vm2, %v725_v29, -inf }
 0x28c   : > { %311 = sbr.rel (!%p309_p7) target bundleno = 57 (0x39), region = 109 }
 0x290   : >> { %s1539_s22 = spop %1538 }
 0x291   : >> { %v602_v19 = vstv %s1539_s22 }
 0x292   : >> { %v609_v4 = vsel %vm603_vm12, %v602_v19, %v1735_v4  }
 0x293   : > { %v666_v4 = vsub.f32 %v1964_v24, %v663_v22  ;;  %v734_v24 = vrot.slane %v2351_v55, %v2008_v41  ;;  %v2076_v41 = vand.u32 127, %v304_v0 }
 0x295   : > { %v668_v36 = vmul.f32 %v666_v4, %v666_v4  ;;  %vm736_vm3 = vcmp.eq.s32.totalorder %v734_v24, %v1891_v1  ;;  %v2079_v47 = vadd.s32 128, %v2076_v41  ;;  %v1764_v4 = vmov 0.0  }
 0x297   : > { %v696_v42 = vadd.f32 %v694_v38, %v668_v36 }
 0x299   : > { %v724_v43 = vadd.f32 %v722_v40, %v696_v42 }
 0x29b   : > { %v726_v30 = vsub.f32 0.0, %v724_v43 }
 0x29d   : > { %v2071_v45 = vsel %vm736_vm3, %v726_v30, -inf }
 0x29e   : > { %v739_v46 = vmax.f32 %v2069_v44, %v2071_v45 }
 0x2a0   : > { %740 = vmax.xlane.f32.xlu1 %v739_v46 }
 0x32d   : > { %v2081_v50 = vpop.xlane.xlu1 %740 }
 0x32e   : > { %vm742_vm4 = vcmp.eq.f32.partialorder %v2069_v44, %v2081_v50  ;;  %vm743_vm5 = vcmp.eq.f32.partialorder %v2071_v45, %v2081_v50  ;;  %vm764_vm10 = vcmp.gt.f32.partialorder %v2081_v50, -inf }
 0x32f   : > { %v744_v51 = vsel %vm742_vm4, %v2076_v41, 256  ;;  %v745_v52 = vsel %vm743_vm5, %v2079_v47, 256 }
 0x330   : > { %vm746_vm6 = vcmp.lt.s32.totalorder %v744_v51, %v745_v52 }
 0x331   : > { %v747_v53 = vsel %vm746_vm6, %v744_v51, %v745_v52 }
 0x332   : > { %v749_v54 = vshra.s32 %v747_v53, 16  ;;  %v748_v48 = vand.u32 65535, %v747_v53 }
 0x334   : > { %v751_v56 = vcvt.s32.f32 %v749_v54  ;;  %v750_v58 = vcvt.s32.f32 %v748_v48 }
 0x336   : > { %752 = vmin.xlane.f32.xlu0 %v751_v56 }
 0x3c3   : > { %v753_v49 = vpop.xlane.xlu0 %752 }
 0x3c4   : > { %vm754_vm7 = vcmp.eq.f32.partialorder %v751_v56, %v753_v49  ;;  %v759_v60 = vcvt.f32.s32 %v753_v49 }
 0x3c5   : > { %v755_v59 = vsel %vm754_vm7, %v750_v58, inf }
 0x3c6   : > { %756 = vmin.xlane.f32.xlu1 %v755_v59  ;;  %v760_v61 = vshll.u32 %v759_v60, 16 }
 0x453   : > { %v757_v5 = vpop.xlane.xlu1 %756 }
 0x454   : > { %v758_v62 = vcvt.f32.s32 %v757_v5 }
 0x456   : > { %v761_v63 = vadd.s32 %v760_v61, %v758_v62 }
 0x458   : > { %vm762_vm8 = vcmp.eq.s32.totalorder %v2076_v41, %v761_v63  ;;  %vm763_vm9 = vcmp.eq.s32.totalorder %v2079_v47, %v761_v63 }
 0x459   : > { %vm2092_vm11 = vmand %vm762_vm8, %vm764_vm10 }
 0x45a   : > { %vm2096_vm12 = vmand %vm763_vm9, %vm764_vm10  ;;  %v771_v6 = vsel %vm2092_vm11, -inf, %v2069_v44  ;;  %v769_v28 = vsel %vm2092_vm11, 1.0, %v1764_v4 }
 0x45b   : > { %v772_v10 = vsel %vm2096_vm12, -inf, %v2071_v45  ;;  %v770_v32 = vsel %vm2096_vm12, 1.0, %v1764_v4 }
 0x45c   : > { %v773_v11 = vmax.f32 %v771_v6, %v772_v10 }
 0x45e   : > { %774 = vmax.xlane.f32.xlu0 %v773_v11 }
 0x4eb   : > { %v775_v7 = vpop.xlane.xlu0 %774 }
 0x4ec   : > { %vm776_vm13 = vcmp.eq.f32.partialorder %v771_v6, %v775_v7  ;;  %vm777_vm14 = vcmp.eq.f32.partialorder %v772_v10, %v775_v7  ;;  %vm798_vm1 = vcmp.gt.f32.partialorder %v775_v7, -inf }
 0x4ed   : > { %v778_v12 = vsel %vm776_vm13, %v2076_v41, 256  ;;  %v779_v13 = vsel %vm777_vm14, %v2079_v47, 256 }
 0x4ee   : > { %vm780_vm15 = vcmp.lt.s32.totalorder %v778_v12, %v779_v13 }
 0x4ef   : > { %v781_v14 = vsel %vm780_vm15, %v778_v12, %v779_v13 }
 0x4f0   : > { %v783_v15 = vshra.s32 %v781_v14, 16  ;;  %v782_v17 = vand.u32 65535, %v781_v14 }
 0x4f2   : > { %v785_v16 = vcvt.s32.f32 %v783_v15  ;;  %v784_v19 = vcvt.s32.f32 %v782_v17 }
 0x4f4   : > { %786 = vmin.xlane.f32.xlu1 %v785_v16 }
 0x581   : > { %v787_v18 = vpop.xlane.xlu1 %786 }
 0x582   : > { %vm788_vm0 = vcmp.eq.f32.partialorder %v785_v16, %v787_v18  ;;  %v793_v20 = vcvt.f32.s32 %v787_v18 }
 0x583   : > { %v789_v3 = vsel %vm788_vm0, %v784_v19, inf }
 0x584   : > { %790 = vmin.xlane.f32.xlu0 %v789_v3  ;;  %v794_v22 = vshll.u32 %v793_v20, 16 }
 0x611   : > { %v791_v21 = vpop.xlane.xlu0 %790 }
 0x612   : > { %v792_v25 = vcvt.f32.s32 %v791_v21 }
 0x614   : > { %v795_v2 = vadd.s32 %v794_v22, %v792_v25 }
 0x616   : > { %vm796_vm2 = vcmp.eq.s32.totalorder %v2076_v41, %v795_v2  ;;  %vm797_vm3 = vcmp.eq.s32.totalorder %v2079_v47, %v795_v2 }
 0x617   : > { %vm2112_vm4 = vmand %vm796_vm2, %vm798_vm1 }
 0x618   : > { %vm2118_vm5 = vmand %vm797_vm3, %vm798_vm1  ;;  %v805_v34 = vsel %vm2112_vm4, -inf, %v771_v6  ;;  %v803_v35 = vsel %vm2112_vm4, 1.0, %v769_v28 }
 0x619   : > { %v804_v36 = vsel %vm2118_vm5, 1.0, %v770_v32  ;;  %v806_v37 = vsel %vm2118_vm5, -inf, %v772_v10 }
 0x61a   : > { %v807_v38 = vmax.f32 %v805_v34, %v806_v37 }
 0x61c   : > { %808 = vmax.xlane.f32.xlu1 %v807_v38 }
 0x6a9   : > { %v809_v39 = vpop.xlane.xlu1 %808 }
 0x6aa   : > { %vm810_vm6 = vcmp.eq.f32.partialorder %v805_v34, %v809_v39  ;;  %vm811_vm7 = vcmp.eq.f32.partialorder %v806_v37, %v809_v39  ;;  %vm832_vm10 = vcmp.gt.f32.partialorder %v809_v39, -inf }
 0x6ab   : > { %v812_v40 = vsel %vm810_vm6, %v2076_v41, 256  ;;  %v813_v23 = vsel %vm811_vm7, %v2079_v47, 256 }
 0x6ac   : > { %vm814_vm8 = vcmp.lt.s32.totalorder %v812_v40, %v813_v23 }
 0x6ad   : > { %v815_v24 = vsel %vm814_vm8, %v812_v40, %v813_v23 }
 0x6ae   : > { %v817_v26 = vshra.s32 %v815_v24, 16  ;;  %v816_v27 = vand.u32 65535, %v815_v24 }
 0x6b0   : > { %v819_v42 = vcvt.s32.f32 %v817_v26  ;;  %v818_v29 = vcvt.s32.f32 %v816_v27 }
 0x6b2   : > { %820 = vmin.xlane.f32.xlu0 %v819_v42 }
 0x73f   : > { %v821_v43 = vpop.xlane.xlu0 %820 }
 0x740   : > { %vm822_vm9 = vcmp.eq.f32.partialorder %v819_v42, %v821_v43  ;;  %v827_v46 = vcvt.f32.s32 %v821_v43 }
 0x741   : > { %v823_v30 = vsel %vm822_vm9, %v818_v29, inf }
 0x742   : > { %824 = vmin.xlane.f32.xlu1 %v823_v30  ;;  %v828_v52 = vshll.u32 %v827_v46, 16 }
 0x7cf   : > { %v825_v51 = vpop.xlane.xlu1 %824 }
 0x7d0   : > { %v826_v53 = vcvt.f32.s32 %v825_v51 }
 0x7d2   : > { %v829_v54 = vadd.s32 %v828_v52, %v826_v53 }
 0x7d4   : > { %vm830_vm11 = vcmp.eq.s32.totalorder %v2076_v41, %v829_v54  ;;  %vm831_vm12 = vcmp.eq.s32.totalorder %v2079_v47, %v829_v54 }
 0x7d5   : > { %vm835_vm13 = vmand %vm830_vm11, %vm832_vm10 }
 0x7d6   : > { %vm836_vm14 = vmand %vm831_vm12, %vm832_vm10  ;;  %v839_v56 = vsel %vm835_vm13, -inf, %v805_v34  ;;  %v2134_v48 = vsel %vm835_vm13, 1.0, %v803_v35 }
 0x7d7   : > { %v2136_v49 = vsel %vm836_vm14, 1.0, %v804_v36  ;;  %v840_v58 = vsel %vm836_vm14, -inf, %v806_v37 }
 0x7d8   : > { %v841_v59 = vmax.f32 %v839_v56, %v840_v58 }
 0x7da   : > { %842 = vmax.xlane.f32.xlu0 %v841_v59 }
 0x867   : > { %v843_v60 = vpop.xlane.xlu0 %842 }
 0x868   : > { %vm844_vm15 = vcmp.eq.f32.partialorder %v839_v56, %v843_v60  ;;  %vm845_vm0 = vcmp.eq.f32.partialorder %v840_v58, %v843_v60  ;;  %vm866_vm3 = vcmp.gt.f32.partialorder %v843_v60, -inf }
 0x869   : > { %v846_v5 = vsel %vm844_vm15, %v2076_v41, 256  ;;  %v847_v61 = vsel %vm845_vm0, %v2079_v47, 256 }
 0x86a   : > { %vm848_vm1 = vcmp.lt.s32.totalorder %v846_v5, %v847_v61 }
 0x86b   : > { %v849_v62 = vsel %vm848_vm1, %v846_v5, %v847_v61 }
 0x86c   : > { %v851_v63 = vshra.s32 %v849_v62, 16  ;;  %v850_v9 = vand.u32 65535, %v849_v62 }
 0x86e   : > { %v853_v8 = vcvt.s32.f32 %v851_v63  ;;  %v852_v10 = vcvt.s32.f32 %v850_v9 }
 0x870   : > { %854 = vmin.xlane.f32.xlu1 %v853_v8 }
 0x8fd   : > { %v855_v6 = vpop.xlane.xlu1 %854 }
 0x8fe   : > { %vm856_vm2 = vcmp.eq.f32.partialorder %v853_v8, %v855_v6  ;;  %v861_v7 = vcvt.f32.s32 %v855_v6 }
 0x8ff   : > { %v857_v11 = vsel %vm856_vm2, %v852_v10, inf }
 0x900   : > { %858 = vmin.xlane.f32.xlu0 %v857_v11  ;;  %v862_v13 = vshll.u32 %v861_v7, 16 }
 0x98d   : > { %v859_v12 = vpop.xlane.xlu0 %858 }
 0x98e   : > { %v860_v14 = vcvt.f32.s32 %v859_v12 }
 0x990   : > { %v863_v15 = vadd.s32 %v862_v13, %v860_v14 }
 0x992   : > { %vm864_vm4 = vcmp.eq.s32.totalorder %v2076_v41, %v863_v15  ;;  %vm865_vm5 = vcmp.eq.s32.totalorder %v2079_v47, %v863_v15 }
 0x993   : > { %vm2142_vm6 = vmand %vm864_vm4, %vm866_vm3 }
 0x994   : > { %vm2146_vm7 = vmand %vm865_vm5, %vm866_vm3  ;;  %v873_v18 = vsel %vm2142_vm6, -inf, %v839_v56  ;;  %v871_v19 = vsel %vm2142_vm6, 1.0, %v2134_v48 }
 0x995   : > { %v872_v3 = vsel %vm2146_vm7, 1.0, %v2136_v49  ;;  %v874_v20 = vsel %vm2146_vm7, -inf, %v840_v58 }
 0x996   : > { %v875_v21 = vmax.f32 %v873_v18, %v874_v20 }
 0x998   : > { %876 = vmax.xlane.f32.xlu1 %v875_v21 }
 0xa25   : > { %v877_v22 = vpop.xlane.xlu1 %876 }
 0xa26   : > { %vm878_vm8 = vcmp.eq.f32.partialorder %v873_v18, %v877_v22  ;;  %vm879_vm9 = vcmp.eq.f32.partialorder %v874_v20, %v877_v22  ;;  %vm900_vm12 = vcmp.gt.f32.partialorder %v877_v22, -inf }
 0xa27   : > { %v880_v25 = vsel %vm878_vm8, %v2076_v41, 256  ;;  %v881_v2 = vsel %vm879_vm9, %v2079_v47, 256 }
 0xa28   : > { %vm882_vm10 = vcmp.lt.s32.totalorder %v880_v25, %v881_v2 }
 0xa29   : > { %v883_v4 = vsel %vm882_vm10, %v880_v25, %v881_v2 }
 0xa2a   : > { %v885_v28 = vshra.s32 %v883_v4, 16  ;;  %v884_v32 = vand.u32 65535, %v883_v4 }
 0xa2c   : > { %v887_v31 = vcvt.s32.f32 %v885_v28  ;;  %v886_v34 = vcvt.s32.f32 %v884_v32 }
 0xa2e   : > { %888 = vmin.xlane.f32.xlu0 %v887_v31 }
 0xabb   : > { %v889_v33 = vpop.xlane.xlu0 %888 }
 0xabc   : > { %vm890_vm11 = vcmp.eq.f32.partialorder %v887_v31, %v889_v33  ;;  %v895_v36 = vcvt.f32.s32 %v889_v33 }
 0xabd   : > { %v891_v35 = vsel %vm890_vm11, %v886_v34, inf }
 0xabe   : > { %892 = vmin.xlane.f32.xlu1 %v891_v35  ;;  %v896_v38 = vshll.u32 %v895_v36, 16 }
 0xb4b   : > { %v893_v37 = vpop.xlane.xlu1 %892 }
 0xb4c   : > { %v894_v39 = vcvt.f32.s32 %v893_v37 }
 0xb4e   : > { %v897_v40 = vadd.s32 %v896_v38, %v894_v39 }
 0xb50   : > { %vm898_vm13 = vcmp.eq.s32.totalorder %v2076_v41, %v897_v40  ;;  %vm899_vm14 = vcmp.eq.s32.totalorder %v2079_v47, %v897_v40 }
 0xb51   : > { %vm903_vm15 = vmand %vm898_vm13, %vm900_vm12 }
 0xb52   : > { %vm904_vm0 = vmand %vm899_vm14, %vm900_vm12  ;;  %v907_v23 = vsel %vm903_vm15, -inf, %v873_v18  ;;  %v2164_v24 = vsel %vm903_vm15, 1.0, %v871_v19 }
 0xb53   : > { %v2166_v26 = vsel %vm904_vm0, 1.0, %v872_v3  ;;  %v908_v42 = vsel %vm904_vm0, -inf, %v874_v20 }
 0xb54   : > { %v909_v27 = vmax.f32 %v907_v23, %v908_v42 }
 0xb56   : > { %910 = vmax.xlane.f32.xlu0 %v909_v27 }
 0xbe3   : > { %v911_v43 = vpop.xlane.xlu0 %910 }
 0xbe4   : > { %vm912_vm1 = vcmp.eq.f32.partialorder %v907_v23, %v911_v43  ;;  %vm913_vm2 = vcmp.eq.f32.partialorder %v908_v42, %v911_v43  ;;  %vm934_vm5 = vcmp.gt.f32.partialorder %v911_v43, -inf }
 0xbe5   : > { %v914_v29 = vsel %vm912_vm1, %v2076_v41, 256  ;;  %v915_v30 = vsel %vm913_vm2, %v2079_v47, 256 }
 0xbe6   : > { %vm916_vm3 = vcmp.lt.s32.totalorder %v914_v29, %v915_v30 }
 0xbe7   : > { %v917_v46 = vsel %vm916_vm3, %v914_v29, %v915_v30 }
 0xbe8   : > { %v919_v51 = vshra.s32 %v917_v46, 16  ;;  %v918_v53 = vand.u32 65535, %v917_v46 }
 0xbea   : > { %v921_v52 = vcvt.s32.f32 %v919_v51  ;;  %v920_v56 = vcvt.s32.f32 %v918_v53 }
 0xbec   : > { %922 = vmin.xlane.f32.xlu1 %v921_v52 }
 0xc79   : > { %v923_v54 = vpop.xlane.xlu1 %922 }
 0xc7a   : > { %vm924_vm4 = vcmp.eq.f32.partialorder %v921_v52, %v923_v54  ;;  %v929_v49 = vcvt.f32.s32 %v923_v54 }
 0xc7b   : > { %v925_v48 = vsel %vm924_vm4, %v920_v56, inf }
 0xc7c   : > { %926 = vmin.xlane.f32.xlu0 %v925_v48  ;;  %v930_v59 = vshll.u32 %v929_v49, 16 }
 0xd09   : > { %v927_v58 = vpop.xlane.xlu0 %926 }
 0xd0a   : > { %v928_v60 = vcvt.f32.s32 %v927_v58 }
 0xd0c   : > { %v931_v5 = vadd.s32 %v930_v59, %v928_v60 }
 0xd0e   : > { %vm932_vm6 = vcmp.eq.s32.totalorder %v2076_v41, %v931_v5  ;;  %vm933_vm7 = vcmp.eq.s32.totalorder %v2079_v47, %v931_v5 }
 0xd0f   : > { %vm2172_vm8 = vmand %vm932_vm6, %vm934_vm5 }
 0xd10   : > { %vm2176_vm9 = vmand %vm933_vm7, %vm934_vm5  ;;  %v941_v63 = vsel %vm2172_vm8, -inf, %v907_v23  ;;  %v939_v8 = vsel %vm2172_vm8, 1.0, %v2164_v24 }
 0xd11   : > { %v940_v9 = vsel %vm2176_vm9, 1.0, %v2166_v26  ;;  %v942_v6 = vsel %vm2176_vm9, -inf, %v908_v42 }
 0xd12   : > { %v943_v10 = vmax.f32 %v941_v63, %v942_v6 }
 0xd14   : > { %944 = vmax.xlane.f32.xlu1 %v943_v10 }
 0xda1   : > { %v945_v11 = vpop.xlane.xlu1 %944 }
 0xda2   : > { %vm946_vm10 = vcmp.eq.f32.partialorder %v941_v63, %v945_v11  ;;  %vm947_vm11 = vcmp.eq.f32.partialorder %v942_v6, %v945_v11  ;;  %vm968_vm14 = vcmp.gt.f32.partialorder %v945_v11, -inf }
 0xda3   : > { %v948_v7 = vsel %vm946_vm10, %v2076_v41, 256  ;;  %v949_v12 = vsel %vm947_vm11, %v2079_v47, 256 }
 0xda4   : > { %vm950_vm12 = vcmp.lt.s32.totalorder %v948_v7, %v949_v12 }
 0xda5   : > { %v951_v13 = vsel %vm950_vm12, %v948_v7, %v949_v12 }
 0xda6   : > { %v953_v14 = vshra.s32 %v951_v13, 16  ;;  %v952_v16 = vand.u32 65535, %v951_v13 }
 0xda8   : > { %v955_v15 = vcvt.s32.f32 %v953_v14  ;;  %v954_v18 = vcvt.s32.f32 %v952_v16 }
 0xdaa   : > { %956 = vmin.xlane.f32.xlu0 %v955_v15 }
 0xe37   : > { %v957_v17 = vpop.xlane.xlu0 %956 }
 0xe38   : > { %vm958_vm13 = vcmp.eq.f32.partialorder %v955_v15, %v957_v17  ;;  %v963_v3 = vcvt.f32.s32 %v957_v17 }
 0xe39   : > { %v959_v19 = vsel %vm958_vm13, %v954_v18, inf }
 0xe3a   : > { %960 = vmin.xlane.f32.xlu1 %v959_v19  ;;  %v964_v21 = vshll.u32 %v963_v3, 16 }
 0xec7   : > { %v961_v20 = vpop.xlane.xlu1 %960 }
 0xec8   : > { %v962_v22 = vcvt.f32.s32 %v961_v20 }
 0xeca   : > { %v965_v25 = vadd.s32 %v964_v21, %v962_v22 }
 0xecc   : > { %vm966_vm15 = vcmp.eq.s32.totalorder %v2076_v41, %v965_v25  ;;  %vm967_vm0 = vcmp.eq.s32.totalorder %v2079_v47, %v965_v25 }
 0xecd   : > { %vm971_vm1 = vmand %vm966_vm15, %vm968_vm14 }
 0xece   : > { %vm972_vm2 = vmand %vm967_vm0, %vm968_vm14  ;;  %v975_v2 = vsel %vm971_vm1, -inf, %v941_v63  ;;  %v2194_v4 = vsel %vm971_vm1, 1.0, %v939_v8 }
 0xecf   : > { %v2196_v28 = vsel %vm972_vm2, 1.0, %v940_v9  ;;  %v976_v31 = vsel %vm972_vm2, -inf, %v942_v6 }
 0xed0   : > { %v977_v32 = vmax.f32 %v975_v2, %v976_v31 }
 0xed2   : > { %978 = vmax.xlane.f32.xlu0 %v977_v32 }
 0xf5f   : > { %v979_v33 = vpop.xlane.xlu0 %978 }
 0xf60   : > { %vm980_vm3 = vcmp.eq.f32.partialorder %v975_v2, %v979_v33  ;;  %vm981_vm4 = vcmp.eq.f32.partialorder %v976_v31, %v979_v33  ;;  %vm1002_vm7 = vcmp.gt.f32.partialorder %v979_v33, -inf }
 0xf61   : > { %v982_v34 = vsel %vm980_vm3, %v2076_v41, 256  ;;  %v983_v35 = vsel %vm981_vm4, %v2079_v47, 256 }
 0xf62   : > { %vm984_vm5 = vcmp.lt.s32.totalorder %v982_v34, %v983_v35 }
 0xf63   : > { %v985_v36 = vsel %vm984_vm5, %v982_v34, %v983_v35 }
 0xf64   : > { %v987_v37 = vshra.s32 %v985_v36, 16  ;;  %v986_v39 = vand.u32 65535, %v985_v36 }
 0xf66   : > { %v989_v38 = vcvt.s32.f32 %v987_v37  ;;  %v988_v23 = vcvt.s32.f32 %v986_v39 }
 0xf68   : > { %990 = vmin.xlane.f32.xlu1 %v989_v38 }
 0xff5   : > { %v991_v40 = vpop.xlane.xlu1 %990 }
 0xff6   : > { %vm992_vm6 = vcmp.eq.f32.partialorder %v989_v38, %v991_v40  ;;  %v997_v26 = vcvt.f32.s32 %v991_v40 }
 0xff7   : > { %v993_v24 = vsel %vm992_vm6, %v988_v23, inf }
 0xff8   : > { %994 = vmin.xlane.f32.xlu0 %v993_v24  ;;  %v998_v27 = vshll.u32 %v997_v26, 16 }
0x1085   : > { %v995_v42 = vpop.xlane.xlu0 %994 }
0x1086   : > { %v996_v43 = vcvt.f32.s32 %v995_v42 }
0x1088   : > { %v999_v29 = vadd.s32 %v998_v27, %v996_v43 }
0x108a   : > { %vm1000_vm8 = vcmp.eq.s32.totalorder %v2076_v41, %v999_v29  ;;  %vm1001_vm9 = vcmp.eq.s32.totalorder %v2079_v47, %v999_v29 }
0x108b   : > { %vm2202_vm10 = vmand %vm1000_vm8, %vm1002_vm7 }
0x108c   : > { %vm2206_vm11 = vmand %vm1001_vm9, %vm1002_vm7  ;;  %v1009_v51 = vsel %vm2202_vm10, -inf, %v975_v2  ;;  %v1007_v52 = vsel %vm2202_vm10, 1.0, %v2194_v4 }
0x108d   : > { %v1008_v53 = vsel %vm2206_vm11, 1.0, %v2196_v28  ;;  %v1010_v54 = vsel %vm2206_vm11, -inf, %v976_v31 }
0x108e   : > { %v1011_v56 = vmax.f32 %v1009_v51, %v1010_v54 }
0x1090   : > { %1012 = vmax.xlane.f32.xlu1 %v1011_v56 }
0x111d   : > { %v1013_v48 = vpop.xlane.xlu1 %1012 }
0x111e   : > { %vm1014_vm12 = vcmp.eq.f32.partialorder %v1009_v51, %v1013_v48  ;;  %vm1015_vm13 = vcmp.eq.f32.partialorder %v1010_v54, %v1013_v48  ;;  %vm1036_vm0 = vcmp.gt.f32.partialorder %v1013_v48, -inf }
0x111f   : > { %v1016_v49 = vsel %vm1014_vm12, %v2076_v41, 256  ;;  %v1017_v58 = vsel %vm1015_vm13, %v2079_v47, 256 }
0x1120   : > { %vm1018_vm14 = vcmp.lt.s32.totalorder %v1016_v49, %v1017_v58 }
0x1121   : > { %v1019_v59 = vsel %vm1018_vm14, %v1016_v49, %v1017_v58 }
0x1122   : > { %v1021_v60 = vshra.s32 %v1019_v59, 16  ;;  %v1020_v61 = vand.u32 65535, %v1019_v59 }
0x1124   : > { %v1023_v5 = vcvt.s32.f32 %v1021_v60  ;;  %v1022_v63 = vcvt.s32.f32 %v1020_v61 }
0x1126   : > { %1024 = vmin.xlane.f32.xlu0 %v1023_v5 }
0x11b3   : > { %v1025_v62 = vpop.xlane.xlu0 %1024 }
0x11b4   : > { %vm1026_vm15 = vcmp.eq.f32.partialorder %v1023_v5, %v1025_v62  ;;  %v1031_v9 = vcvt.f32.s32 %v1025_v62 }
0x11b5   : > { %v1027_v8 = vsel %vm1026_vm15, %v1022_v63, inf }
0x11b6   : > { %1028 = vmin.xlane.f32.xlu1 %v1027_v8  ;;  %v1032_v10 = vshll.u32 %v1031_v9, 16 }
0x1243   : > { %v1029_v6 = vpop.xlane.xlu1 %1028 }
0x1244   : > { %v1030_v11 = vcvt.f32.s32 %v1029_v6 }
0x1246   : > { %v1033_v7 = vadd.s32 %v1032_v10, %v1030_v11 }
0x1248   : > { %vm1034_vm1 = vcmp.eq.s32.totalorder %v2076_v41, %v1033_v7  ;;  %vm1035_vm2 = vcmp.eq.s32.totalorder %v2079_v47, %v1033_v7 }
0x1249   : > { %vm1039_vm3 = vmand %vm1034_vm1, %vm1036_vm0 }
0x124a   : > { %vm1040_vm4 = vmand %vm1035_vm2, %vm1036_vm0  ;;  %v1043_v12 = vsel %vm1039_vm3, -inf, %v1009_v51  ;;  %v2224_v13 = vsel %vm1039_vm3, 1.0, %v1007_v52 }
0x124b   : > { %v2226_v14 = vsel %vm1040_vm4, 1.0, %v1008_v53  ;;  %v1044_v15 = vsel %vm1040_vm4, -inf, %v1010_v54 }
0x124c   : > { %v1045_v16 = vmax.f32 %v1043_v12, %v1044_v15 }
0x124e   : > { %1046 = vmax.xlane.f32.xlu0 %v1045_v16 }
0x12db   : > { %v1047_v17 = vpop.xlane.xlu0 %1046 }
0x12dc   : > { %vm1048_vm5 = vcmp.eq.f32.partialorder %v1043_v12, %v1047_v17  ;;  %vm1049_vm6 = vcmp.eq.f32.partialorder %v1044_v15, %v1047_v17  ;;  %vm1070_vm9 = vcmp.gt.f32.partialorder %v1047_v17, -inf }
0x12dd   : > { %v1050_v18 = vsel %vm1048_vm5, %v2076_v41, 256  ;;  %v1051_v19 = vsel %vm1049_vm6, %v2079_v47, 256 }
0x12de   : > { %vm1052_vm7 = vcmp.lt.s32.totalorder %v1050_v18, %v1051_v19 }
0x12df   : > { %v1053_v3 = vsel %vm1052_vm7, %v1050_v18, %v1051_v19 }
0x12e0   : > { %v1055_v20 = vshra.s32 %v1053_v3, 16  ;;  %v1054_v22 = vand.u32 65535, %v1053_v3 }
0x12e2   : > { %v1057_v21 = vcvt.s32.f32 %v1055_v20  ;;  %v1056_v2 = vcvt.s32.f32 %v1054_v22 }
0x12e4   : > { %1058 = vmin.xlane.f32.xlu1 %v1057_v21 }
0x1371   : > { %v1059_v25 = vpop.xlane.xlu1 %1058 }
0x1372   : > { %vm1060_vm8 = vcmp.eq.f32.partialorder %v1057_v21, %v1059_v25  ;;  %v1065_v28 = vcvt.f32.s32 %v1059_v25 }
0x1373   : > { %v1061_v4 = vsel %vm1060_vm8, %v1056_v2, inf }
0x1374   : > { %1062 = vmin.xlane.f32.xlu0 %v1061_v4  ;;  %v1066_v32 = vshll.u32 %v1065_v28, 16 }
0x1401   : > { %v1063_v31 = vpop.xlane.xlu0 %1062 }
0x1402   : > { %v1064_v33 = vcvt.f32.s32 %v1063_v31 }
0x1404   : > { %v1067_v34 = vadd.s32 %v1066_v32, %v1064_v33 }
0x1406   : > { %vm1068_vm10 = vcmp.eq.s32.totalorder %v2076_v41, %v1067_v34  ;;  %vm1069_vm11 = vcmp.eq.s32.totalorder %v2079_v47, %v1067_v34 }
0x1407   : > { %vm2232_vm12 = vmand %vm1068_vm10, %vm1070_vm9 }
0x1408   : > { %vm2236_vm13 = vmand %vm1069_vm11, %vm1070_vm9  ;;  %v1077_v37 = vsel %vm2232_vm12, -inf, %v1043_v12  ;;  %v1075_v38 = vsel %vm2232_vm12, 1.0, %v2224_v13 }
0x1409   : > { %v1076_v39 = vsel %vm2236_vm13, 1.0, %v2226_v14  ;;  %v1078_v40 = vsel %vm2236_vm13, -inf, %v1044_v15 }
0x140a   : > { %v1079_v23 = vmax.f32 %v1077_v37, %v1078_v40 }
0x140c   : > { %1080 = vmax.xlane.f32.xlu1 %v1079_v23 }
0x1499   : > { %v1081_v24 = vpop.xlane.xlu1 %1080 }
0x149a   : > { %vm1082_vm14 = vcmp.eq.f32.partialorder %v1077_v37, %v1081_v24  ;;  %vm1083_vm15 = vcmp.eq.f32.partialorder %v1078_v40, %v1081_v24  ;;  %vm1104_vm2 = vcmp.gt.f32.partialorder %v1081_v24, -inf }
0x149b   : > { %v1084_v26 = vsel %vm1082_vm14, %v2076_v41, 256  ;;  %v1085_v42 = vsel %vm1083_vm15, %v2079_v47, 256 }
0x149c   : > { %vm1086_vm0 = vcmp.lt.s32.totalorder %v1084_v26, %v1085_v42 }
0x149d   : > { %v1087_v27 = vsel %vm1086_vm0, %v1084_v26, %v1085_v42 }
0x149e   : > { %v1089_v43 = vshra.s32 %v1087_v27, 16  ;;  %v1088_v30 = vand.u32 65535, %v1087_v27 }
0x14a0   : > { %v1091_v29 = vcvt.s32.f32 %v1089_v43  ;;  %v1090_v51 = vcvt.s32.f32 %v1088_v30 }
0x14a2   : > { %1092 = vmin.xlane.f32.xlu0 %v1091_v29 }
0x152f   : > { %v1093_v46 = vpop.xlane.xlu0 %1092 }
0x1530   : > { %vm1094_vm1 = vcmp.eq.f32.partialorder %v1091_v29, %v1093_v46  ;;  %v1099_v53 = vcvt.f32.s32 %v1093_v46 }
0x1531   : > { %v1095_v52 = vsel %vm1094_vm1, %v1090_v51, inf }
0x1532   : > { %1096 = vmin.xlane.f32.xlu1 %v1095_v52  ;;  %v1100_v56 = vshll.u32 %v1099_v53, 16 }
0x15bf   : > { %v1097_v54 = vpop.xlane.xlu1 %1096 }
0x15c0   : > { %v1098_v48 = vcvt.f32.s32 %v1097_v54 }
0x15c2   : > { %v1101_v49 = vadd.s32 %v1100_v56, %v1098_v48 }
0x15c4   : > { %vm1102_vm3 = vcmp.eq.s32.totalorder %v2076_v41, %v1101_v49  ;;  %vm1103_vm4 = vcmp.eq.s32.totalorder %v2079_v47, %v1101_v49 }
0x15c5   : > { %vm1107_vm5 = vmand %vm1102_vm3, %vm1104_vm2 }
0x15c6   : > { %vm1108_vm6 = vmand %vm1103_vm4, %vm1104_vm2  ;;  %v1111_v58 = vsel %vm1107_vm5, -inf, %v1077_v37  ;;  %v2254_v59 = vsel %vm1107_vm5, 1.0, %v1075_v38 }
0x15c7   : > { %v2256_v60 = vsel %vm1108_vm6, 1.0, %v1076_v39  ;;  %v1112_v5 = vsel %vm1108_vm6, -inf, %v1078_v40 }
0x15c8   : > { %v1113_v61 = vmax.f32 %v1111_v58, %v1112_v5 }
0x15ca   : > { %1114 = vmax.xlane.f32.xlu0 %v1113_v61 }
0x1657   : > { %v1115_v62 = vpop.xlane.xlu0 %1114 }
0x1658   : > { %vm1116_vm7 = vcmp.eq.f32.partialorder %v1111_v58, %v1115_v62  ;;  %vm1117_vm8 = vcmp.eq.f32.partialorder %v1112_v5, %v1115_v62  ;;  %vm1138_vm11 = vcmp.gt.f32.partialorder %v1115_v62, -inf }
0x1659   : > { %v1118_v63 = vsel %vm1116_vm7, %v2076_v41, 256  ;;  %v1119_v8 = vsel %vm1117_vm8, %v2079_v47, 256 }
0x165a   : > { %vm1120_vm9 = vcmp.lt.s32.totalorder %v1118_v63, %v1119_v8 }
0x165b   : > { %v1121_v9 = vsel %vm1120_vm9, %v1118_v63, %v1119_v8 }
0x165c   : > { %v1123_v6 = vshra.s32 %v1121_v9, 16  ;;  %v1122_v11 = vand.u32 65535, %v1121_v9 }
0x165e   : > { %v1125_v10 = vcvt.s32.f32 %v1123_v6  ;;  %v1124_v12 = vcvt.s32.f32 %v1122_v11 }
0x1660   : > { %1126 = vmin.xlane.f32.xlu1 %v1125_v10 }
0x16ed   : > { %v1127_v7 = vpop.xlane.xlu1 %1126 }
0x16ee   : > { %vm1128_vm10 = vcmp.eq.f32.partialorder %v1125_v10, %v1127_v7  ;;  %v1133_v14 = vcvt.f32.s32 %v1127_v7 }
0x16ef   : > { %v1129_v13 = vsel %vm1128_vm10, %v1124_v12, inf }
0x16f0   : > { %1130 = vmin.xlane.f32.xlu0 %v1129_v13  ;;  %v1134_v16 = vshll.u32 %v1133_v14, 16 }
0x177d   : > { %v1131_v15 = vpop.xlane.xlu0 %1130 }
0x177e   : > { %v1132_v17 = vcvt.f32.s32 %v1131_v15 }
0x1780   : > { %v1135_v18 = vadd.s32 %v1134_v16, %v1132_v17 }
0x1782   : > { %vm1136_vm12 = vcmp.eq.s32.totalorder %v2076_v41, %v1135_v18  ;;  %vm1137_vm13 = vcmp.eq.s32.totalorder %v2079_v47, %v1135_v18 }
0x1783   : > { %vm2262_vm14 = vmand %vm1136_vm12, %vm1138_vm11 }
0x1784   : > { %vm2266_vm15 = vmand %vm1137_vm13, %vm1138_vm11  ;;  %v1145_v20 = vsel %vm2262_vm14, -inf, %v1111_v58  ;;  %v1143_v21 = vsel %vm2262_vm14, 1.0, %v2254_v59 }
0x1785   : > { %v1144_v22 = vsel %vm2266_vm15, 1.0, %v2256_v60  ;;  %v1146_v25 = vsel %vm2266_vm15, -inf, %v1112_v5 }
0x1786   : > { %v1147_v2 = vmax.f32 %v1145_v20, %v1146_v25 }
0x1788   : > { %1148 = vmax.xlane.f32.xlu1 %v1147_v2 }
0x1815   : > { %v1149_v4 = vpop.xlane.xlu1 %1148 }
0x1816   : > { %vm1150_vm0 = vcmp.eq.f32.partialorder %v1145_v20, %v1149_v4  ;;  %vm1151_vm1 = vcmp.eq.f32.partialorder %v1146_v25, %v1149_v4  ;;  %vm1172_vm4 = vcmp.gt.f32.partialorder %v1149_v4, -inf }
0x1817   : > { %v1152_v28 = vsel %vm1150_vm0, %v2076_v41, 256  ;;  %v1153_v31 = vsel %vm1151_vm1, %v2079_v47, 256 }
0x1818   : > { %vm1154_vm2 = vcmp.lt.s32.totalorder %v1152_v28, %v1153_v31 }
0x1819   : > { %v1155_v32 = vsel %vm1154_vm2, %v1152_v28, %v1153_v31 }
0x181a   : > { %v1157_v33 = vshra.s32 %v1155_v32, 16  ;;  %v1156_v35 = vand.u32 65535, %v1155_v32 }
0x181c   : > { %v1159_v34 = vcvt.s32.f32 %v1157_v33  ;;  %v1158_v37 = vcvt.s32.f32 %v1156_v35 }
0x181e   : > { %1160 = vmin.xlane.f32.xlu0 %v1159_v34 }
0x18ab   : > { %v1161_v36 = vpop.xlane.xlu0 %1160 }
0x18ac   : > { %vm1162_vm3 = vcmp.eq.f32.partialorder %v1159_v34, %v1161_v36  ;;  %v1167_v39 = vcvt.f32.s32 %v1161_v36 }
0x18ad   : > { %v1163_v38 = vsel %vm1162_vm3, %v1158_v37, inf }
0x18ae   : > { %1164 = vmin.xlane.f32.xlu1 %v1163_v38  ;;  %v1168_v23 = vshll.u32 %v1167_v39, 16  ;;  %v1765_v39 = vmov 1966171168  }
0x193b   : > { %v1165_v40 = vpop.xlane.xlu1 %1164 }
0x193c   : > { %v1166_v24 = vcvt.f32.s32 %v1165_v40  ;;  %v614_v40 = vunpack.c.l.s4 %v1765_v39 }
0x193e   : > { %v1169_v26 = vadd.s32 %v1168_v23, %v1166_v24 }
0x1940   : > { %vm1170_vm5 = vcmp.eq.s32.totalorder %v2076_v41, %v1169_v26  ;;  %vm1171_vm6 = vcmp.eq.s32.totalorder %v2079_v47, %v1169_v26 }
0x1941   : > { %vm1175_vm7 = vmand %vm1170_vm5, %vm1172_vm4 }
0x1942   : > { %vm1176_vm8 = vmand %vm1171_vm6, %vm1172_vm4  ;;  %v1179_v42 = vsel %vm1175_vm7, -inf, %v1145_v20  ;;  %v2284_v27 = vsel %vm1175_vm7, 1.0, %v1143_v21 }
0x1943   : > { %v1180_v43 = vsel %vm1176_vm8, -inf, %v1146_v25  ;;  %v2286_v29 = vsel %vm1176_vm8, 1.0, %v1144_v22  ;;  %v1249_v22 = vsub.f32 %v2069_v44, %v2081_v50  ;;  %v1250_v25 = vsub.f32 %v2071_v45, %v2081_v50 }
0x1944   : > { %v1181_v30 = vmax.f32 %v1179_v42, %v1180_v43 }
0x1945   : > { %v1251_v2 = vmul.f32 1.442695, %v1249_v22  ;;  %v1253_v4 = vmul.f32 1.442695, %v1250_v25 }
0x1946   : > { %1182 = vmax.xlane.f32.xlu0 %v1181_v30 }
0x1947   : > { %1641 = vpow2.f32 %v1251_v2 }
0x1948   : > { %1643 = vpow2.f32 %v1253_v4 }
0x1951   : > { %v1642_v35 = vpop.eup %1641 }
0x1952   : > { %v1644_v45 = vpop.eup %1643 }
0x19d3   : > { %v1183_v46 = vpop.xlane.xlu0 %1182 }
0x19d4   : > { %vm1184_vm9 = vcmp.eq.f32.partialorder %v1179_v42, %v1183_v46  ;;  %vm1185_vm10 = vcmp.eq.f32.partialorder %v1180_v43, %v1183_v46  ;;  %vm1206_vm13 = vcmp.gt.f32.partialorder %v1183_v46, -inf }
0x19d5   : > { %v1186_v51 = vsel %vm1184_vm9, %v2076_v41, 256  ;;  %v1187_v52 = vsel %vm1185_vm10, %v2079_v47, 256 }
0x19d6   : > { %vm1188_vm11 = vcmp.lt.s32.totalorder %v1186_v51, %v1187_v52 }
0x19d7   : > { %v1189_v53 = vsel %vm1188_vm11, %v1186_v51, %v1187_v52  ;;  %v636_v51 = vld [vmem:[%s1882_s14 + $0x10] sm:$0xff] }
0x19d8   : > { %v1191_v54 = vshra.s32 %v1189_v53, 16  ;;  %v1190_v48 = vand.u32 65535, %v1189_v53 }
0x19da   : > { %v1193_v56 = vcvt.s32.f32 %v1191_v54  ;;  %v1192_v58 = vcvt.s32.f32 %v1190_v48 }
0x19dc   : > { %1194 = vmin.xlane.f32.xlu1 %v1193_v56 }
0x1a69   : > { %v1195_v49 = vpop.xlane.xlu1 %1194 }
0x1a6a   : > { %vm1196_vm12 = vcmp.eq.f32.partialorder %v1193_v56, %v1195_v49  ;;  %v1201_v60 = vcvt.f32.s32 %v1195_v49 }
0x1a6b   : > { %v1197_v59 = vsel %vm1196_vm12, %v1192_v58, inf }
0x1a6c   : > { %1198 = vmin.xlane.f32.xlu0 %v1197_v59  ;;  %v1202_v61 = vshll.u32 %v1201_v60, 16 }
0x1af9   : > { %v1199_v5 = vpop.xlane.xlu0 %1198 }
0x1afa   : > { %v1200_v62 = vcvt.f32.s32 %v1199_v5 }
0x1afc   : > { %v1203_v63 = vadd.s32 %v1202_v61, %v1200_v62 }
0x1afe   : > { %vm1204_vm14 = vcmp.eq.s32.totalorder %v2076_v41, %v1203_v63  ;;  %vm1205_vm15 = vcmp.eq.s32.totalorder %v2079_v47, %v1203_v63 }
0x1aff   : > { %vm2292_vm0 = vmand %vm1204_vm14, %vm1206_vm13  ;;  %vm1339_vm14 = vcmask 64512  }
0x1b00   : > { %vm2296_vm1 = vmand %vm1205_vm15, %vm1206_vm13  ;;  %v1213_v6 = vsel %vm2292_vm0, -inf, %v1179_v42  ;;  %v1211_v10 = vsel %vm2292_vm0, 1.0, %v2284_v27  ;;  %vm631_vm13 = vcmp.lt.s32.totalorder %v304_v0, 256  ;;  %v634_v0 = vld [vmem:[%s1882_s14] sm:$0xff] }
0x1b01   : > { %v1212_v11 = vsel %vm2296_vm1, 1.0, %v2286_v29  ;;  %v1214_v7 = vsel %vm2296_vm1, -inf, %v1180_v43  ;;  %v635_v43 = vld [vmem:[%s1882_s14 + $0x8] sm:$0xff]  ;;  %v637_v29 = vld [vmem:[%s1882_s14 + $0x18] sm:$0xff] }
0x1b02   : > { %v1215_v12 = vmax.f32 %v1213_v6, %v1214_v7  ;;  %1328 = vmatprep.mubr.f32.mxu0 %v635_v43  ;;  %1333 = vmatprep.mubr.f32.mxu1 %v637_v29 }
0x1b04   : > { %1216 = vmax.xlane.f32.xlu1 %v1215_v12 }
0x1b91   : > { %v1217_v13 = vpop.xlane.xlu1 %1216 }
0x1b92   : > { %vm1218_vm2 = vcmp.eq.f32.partialorder %v1213_v6, %v1217_v13  ;;  %vm1219_vm3 = vcmp.eq.f32.partialorder %v1214_v7, %v1217_v13  ;;  %vm1240_vm6 = vcmp.gt.f32.partialorder %v1217_v13, -inf }
0x1b93   : > { %v1220_v14 = vsel %vm1218_vm2, %v2076_v41, 256  ;;  %v1221_v15 = vsel %vm1219_vm3, %v2079_v47, 256 }
0x1b94   : > { %vm1222_vm4 = vcmp.lt.s32.totalorder %v1220_v14, %v1221_v15 }
0x1b95   : > { %v1223_v16 = vsel %vm1222_vm4, %v1220_v14, %v1221_v15 }
0x1b96   : > { %v1225_v17 = vshra.s32 %v1223_v16, 16  ;;  %v1224_v19 = vand.u32 65535, %v1223_v16 }
0x1b98   : > { %v1227_v18 = vcvt.s32.f32 %v1225_v17  ;;  %v1226_v20 = vcvt.s32.f32 %v1224_v19 }
0x1b9a   : > { %1228 = vmin.xlane.f32.xlu0 %v1227_v18 }
0x1c27   : > { %v1229_v3 = vpop.xlane.xlu0 %1228 }
0x1c28   : > { %vm1230_vm5 = vcmp.eq.f32.partialorder %v1227_v18, %v1229_v3  ;;  %v1235_v28 = vcvt.f32.s32 %v1229_v3 }
0x1c29   : > { %v1231_v21 = vsel %vm1230_vm5, %v1226_v20, inf }
0x1c2a   : > { %1232 = vmin.xlane.f32.xlu1 %v1231_v21  ;;  %v1236_v32 = vshll.u32 %v1235_v28, 16 }
0x1cb7   : > { %v1233_v31 = vpop.xlane.xlu1 %1232 }
0x1cb8   : > { %v1234_v33 = vcvt.f32.s32 %v1233_v31 }
0x1cba   : > { %v1237_v34 = vadd.s32 %v1236_v32, %v1234_v33 }
0x1cbc   : > { %vm1238_vm7 = vcmp.eq.s32.totalorder %v2076_v41, %v1237_v34  ;;  %vm1239_vm8 = vcmp.eq.s32.totalorder %v2079_v47, %v1237_v34  ;;  %v612_v41 = vcombine.high %v2352_v57, %v2351_v55  ;;  %v615_v47 = vunpack.c.0.s8 %v614_v40 }
0x1cbd   : > { %vm1243_vm9 = vmand %vm1238_vm7, %vm1240_vm6 }
0x1cbe   : > { %vm1244_vm10 = vmand %vm1239_vm8, %vm1240_vm6  ;;  %v1245_v44 = vsel %vm1243_vm9, 1.0, %v1211_v10  ;;  %v618_v23 = vsub.s32 %v615_v47, %v1891_v1 }
0x1cbf   : > { %v1246_v36 = vsel %vm1244_vm10, 1.0, %v1212_v11  ;;  %vm1247_vm11 = vcmp.gt.f32.partialorder %v1245_v44, 0.0 }
0x1cc0   : > { %vm1248_vm12 = vcmp.gt.f32.partialorder %v1246_v36, 0.0  ;;  %v1255_v50 = vsel %vm1247_vm11, %v1642_v35, 0.0  ;;  %v619_v24 = vrot.slane %v612_v41, %v618_v23 }
0x1cc1   : > { %v1256_v37 = vsel %vm1248_vm12, %v1644_v45, 0.0 }
0x1cc2   : > { %v1257_v38 = vadd.f32 %v1256_v37, %v1255_v50  ;;  %v620_v26 = vcombine.high %v619_v24, %v619_v24 }
0x1cc4   : > { %1258 = vadd.xlane.f32.xlu0 %v1257_v38  ;;  %v627_v42 = vrot.slane %v620_v26, %v618_v23 }
0x1cc6   : > { %v628_v27 = vcombine.high %v627_v42, %v627_v42 }
0x1cc8   : > { %633 = vst.msk [vmem:[%s1917_s9] sm:$0x3] %vm631_vm13, %v628_v27 }
0x1d51   : > { %v1259_v30 = vpop.xlane.xlu0 %1258 }
0x1d52   : > { %v1260_v46 = vmax.f32 %v1259_v30, 1e-20 }
0x1d54   : > { %1645 = vrcp.f32 %v1260_v46 }
0x1d5e   : > { %v1646_v55 = vpop.eup %1645 }
0x1d5f   : > { %v1263_v1 = vmul.f32 %v1646_v55, %v1256_v37  ;;  %v1262_v57 = vmul.f32 %v1646_v55, %v1255_v50 }
0x1d61   : > { %1264 = vmatprep.subr.mxu0 %v1263_v1  ;;  %1536 = vmatprep.subr.mxu1 %v1263_v1 }
0x1d62   : > { %1265 = vmatpush1.xpose.msra.mxu0 %v1262_v57  ;;  %1537 = vmatpush1.xpose.msra.mxu1 %v1262_v57 }
0x1d65   : > { %1329 = vmatmul.mubr.f32.vlgmr.msra.gmra.mrb[0].mxu0 %v634_v0  ;;  %1334 = vmatmul.mubr.f32.vlgmr.msra.gmra.mrb[0].mxu1 %v636_v51 }
0x1e38   : > { %v1330_v52 = vpop.f32.mrb[0].mxu0  ;;  %v1335_v53 = vpop.f32.mrb[0].mxu1 }
0x1e39   : > { %1340 = vst.msk [vmem:[%s1910_s29] sm:$0xff] %vm1339_vm14, %v1330_v52  ;;  %1341 = vst.msk [vmem:[%s1910_s29 + $0x8] sm:$0xff] %vm1339_vm14, %v1335_v53  ;;  %v1332_v54 = vpop.f32.mrb[1].mxu0  ;;  %v1337_v56 = vpop.f32.mrb[1].mxu1 }
0x1e3a PF: > { %p16_p8 = scmp.ge.s32.totalorder %s1818_s23, 4   ;;  %s2388_s18 = smov %s1723_s19 }
0x1e3b   : > { %s2389_s19 = smov %s1727_s20  ;;  %s2390_s20 = smov %s1828_s26 }
0x1e3c   : > { %s2391_s21 = smov %s1818_s23  ;;  %18 = sbr.rel (!%p16_p8) target bundleno = 3 (0x3), region = 120 }
0x1e43   :  { %1391 = vsyncpa [#allocation3], 1 }
0x1e44   :  { %1393 = vsyncpa [#allocation3 + $0x1], 1 }

</bundles_post_ra>
